<compile_context>
chip_gen: v5e
topology: v5e:2x2
jax: 0.10.0
libtpu: 0.0.40
codegen_flags: <defaults>
</compile_context>

<pallas_src>
import jax
import jax.numpy as jnp
import numpy as np
from jax.experimental import pallas as pl
from jax.experimental.pallas import tpu as pltpu


# ------------------------------- fused kernel --------------------------------


def _bottleneck_kernel(x_ref, w1_ref, s1_ref, b1_ref,
                       w2_ref, s2_ref, b2_ref,
                       w3_ref, s3_ref, b3_ref,
                       o_ref, xp_ref, acc_ref):
    # Per-image fused Bottleneck forward.
    #   x_ref : (H, W, Cin)        input image (also the identity branch)
    #   w1    : (Cin, Cmid)        1x1 conv1
    #   w2    : (9, Cmid, Cmid)    3x3 conv2 taps (ky*3+kx leading index)
    #   w3    : (Cmid, Cexp)       1x1 conv3
    #   s*/b* : (1, C)             folded BatchNorm scale / bias
    #   o_ref : (H, W, Cexp)       output image
    #   xp_ref: (H+2, W+2, Cmid)   VMEM scratch, zero-padded conv2 input
    #   acc_ref: (H*W, Cmid)       VMEM scratch, conv2 accumulator
    H, W, Cin = x_ref.shape
    Cmid = w1_ref.shape[1]
    Cexp = w3_ref.shape[1]

    x2d = x_ref[...].reshape(H * W, Cin)

    # conv1 (1x1) + bn1 + relu -> interior of the zero-padded VMEM scratch.
    y1 = jnp.dot(x2d, w1_ref[...], preferred_element_type=jnp.float32)
    y1 = jnp.maximum(y1 * s1_ref[...] + b1_ref[...], 0.0)
    xp_ref[...] = jnp.zeros_like(xp_ref)
    xp_ref[1:1 + H, 1:1 + W, :] = y1.reshape(H, W, Cmid)

    # conv2 (3x3, stride=1, pad=1) + bn2 + relu, accumulated in VMEM scratch.
    acc_ref[...] = jnp.zeros_like(acc_ref)
    for ky in range(3):
        for kx in range(3):
            patch = xp_ref[ky:ky + H, kx:kx + W, :].reshape(H * W, Cmid)
            acc_ref[...] += jnp.dot(patch, w2_ref[ky * 3 + kx],
                                    preferred_element_type=jnp.float32)
    y2 = jnp.maximum(acc_ref[...] * s2_ref[...] + b2_ref[...], 0.0)

    # conv3 (1x1) + bn3 + relu, THEN residual add, THEN final relu
    # (exact PyTorch module ordering).
    y3 = jnp.dot(y2, w3_ref[...], preferred_element_type=jnp.float32)
    y3 = jnp.maximum(y3 * s3_ref[...] + b3_ref[...], 0.0)
    out = jnp.maximum(y3 + x2d, 0.0)          # identity: Cin == Cexp, stride 1
    o_ref[...] = out.reshape(H, W, Cexp)


# ------------------------------ Bottleneck forward ----------------------------


def bottleneck_forward(x_nchw, params, stride=1):
    """Forward pass of the Bottleneck block. Input/output are NCHW float32."""
    x = jnp.transpose(x_nchw, (0, 2, 3, 1)).astype(jnp.float32)  # NHWC
    N, H, W, Cin = x.shape
    Cmid = params["w1"].shape[1]
    Cexp = params["w3"].shape[1]

    # downsample is None in this module configuration: the residual add is
    # only shape-valid when stride == 1 and in_ch == expansion * out_ch.
    assert stride == 1 and Cin == Cexp, (
        "downsample=None requires stride == 1 and in_ch == 4 * out_ch")
    # TODO(synk): non-None downsample (strided 1x1 conv + BN on the identity
    # path, and strided conv2) is not implemented here.

    out = pl.pallas_call(
        _bottleneck_kernel,
        out_shape=jax.ShapeDtypeStruct((N, H, W, Cexp), jnp.float32),
        grid=(N,),
        in_specs=[
            pl.BlockSpec((None, H, W, Cin), lambda n: (n, 0, 0, 0)),
            pl.BlockSpec((Cin, Cmid), lambda n: (0, 0)),       # w1 (VMEM-resident)
            pl.BlockSpec((1, Cmid), lambda n: (0, 0)),         # s1
            pl.BlockSpec((1, Cmid), lambda n: (0, 0)),         # b1
            pl.BlockSpec((9, Cmid, Cmid), lambda n: (0, 0, 0)),  # w2 taps
            pl.BlockSpec((1, Cmid), lambda n: (0, 0)),         # s2
            pl.BlockSpec((1, Cmid), lambda n: (0, 0)),         # b2
            pl.BlockSpec((Cmid, Cexp), lambda n: (0, 0)),      # w3
            pl.BlockSpec((1, Cexp), lambda n: (0, 0)),         # s3
            pl.BlockSpec((1, Cexp), lambda n: (0, 0)),         # b3
        ],
        out_specs=pl.BlockSpec((None, H, W, Cexp), lambda n: (n, 0, 0, 0)),
        scratch_shapes=[
            pltpu.VMEM((H + 2, W + 2, Cmid), jnp.float32),  # padded conv2 input
            pltpu.VMEM((H * W, Cmid), jnp.float32),         # conv2 accumulator
        ],
        compiler_params=pltpu.CompilerParams(
            dimension_semantics=("parallel",)),
    )(x, params["w1"], params["s1"], params["b1"],
      params["w2_taps"], params["s2"], params["b2"],
      params["w3"], params["s3"], params["b3"])

    return jnp.transpose(out, (0, 3, 1, 2))  # back to NCHW


# ------------------------------ params / reference ----------------------------


def _fold_bn(gamma, beta, mean, var, eps=1e-5):
    scale = gamma / jnp.sqrt(var + eps)
    bias = beta - mean * scale
    return scale, bias


def make_params(key, in_ch, out_ch):
    exp = 4
    ks = jax.random.split(key, 8)

    def bn_params(k, c):
        k1, k2, k3, k4 = jax.random.split(k, 4)
        gamma = 1.0 + 0.1 * jax.random.normal(k1, (c,), jnp.float32)
        beta = 0.1 * jax.random.normal(k2, (c,), jnp.float32)
        mean = 0.1 * jax.random.normal(k3, (c,), jnp.float32)
        var = 1.0 + 0.1 * jnp.abs(jax.random.normal(k4, (c,), jnp.float32))
        return _fold_bn(gamma, beta, mean, var)

    w1 = 0.1 * jax.random.normal(ks[0], (in_ch, out_ch), jnp.float32)
    w2 = 0.1 * jax.random.normal(ks[1], (3, 3, out_ch, out_ch), jnp.float32)
    w3 = 0.1 * jax.random.normal(ks[2], (out_ch, out_ch * exp), jnp.float32)
    s1, b1 = bn_params(ks[3], out_ch)
    s2, b2 = bn_params(ks[4], out_ch)
    s3, b3 = bn_params(ks[5], out_ch * exp)

    return {
        "w1": w1,
        "w2": w2,                                        # HWIO, for reference
        "w2_taps": w2.reshape(9, out_ch, out_ch),        # kernel layout
        "w3": w3,
        "s1": s1.reshape(1, -1), "b1": b1.reshape(1, -1),
        "s2": s2.reshape(1, -1), "b2": b2.reshape(1, -1),
        "s3": s3.reshape(1, -1), "b3": b3.reshape(1, -1),
    }


def reference_forward(x_nchw, p, stride=1):
    x = jnp.transpose(x_nchw, (0, 2, 3, 1)).astype(jnp.float32)
    y = jnp.einsum("nhwc,co->nhwo", x, p["w1"])
    y = jnp.maximum(y * p["s1"] + p["b1"], 0.0)
    y = jax.lax.conv_general_dilated(
        y, p["w2"], window_strides=(stride, stride),
        padding=((1, 1), (1, 1)),
        dimension_numbers=("NHWC", "HWIO", "NHWC"))
    y = jnp.maximum(y * p["s2"] + p["b2"], 0.0)
    y = jnp.einsum("nhwc,co->nhwo", y, p["w3"])
    y = jnp.maximum(y * p["s3"] + p["b3"], 0.0)
    y = jnp.maximum(y + x, 0.0)
    return jnp.transpose(y, (0, 3, 1, 2))


# ----------------------------------- main -------------------------------------


if __name__ == "__main__":
    # Small shapes: identity add without downsample requires in_ch == 4*out_ch.
    N, in_ch, out_ch, H, W = 2, 16, 4, 8, 8
    stride = 1

    key = jax.random.PRNGKey(0)
    k_x, k_p = jax.random.split(key)
    x = jax.random.normal(k_x, (N, in_ch, H, W), jnp.float32)
    params = make_params(k_p, in_ch, out_ch)

    out = bottleneck_forward(x, params, stride=stride)
    out = jax.block_until_ready(out)

    ref = jax.block_until_ready(reference_forward(x, params, stride=stride))
    np.testing.assert_allclose(np.asarray(out), np.asarray(ref),
                               rtol=1e-4, atol=1e-4)
    assert out.shape == (N, out_ch * 4, H, W)
    print("KERNEL_OK")
</pallas_src>

<mosaic_0001>
module attributes {stable_mosaic.version = 11 : i64} {
  func.func @_bottleneck_kernel(%arg0: i32, %arg1: memref<1x8x8x16xf32, #tpu.memory_space<vmem>>, %arg2: memref<16x4xf32, #tpu.memory_space<vmem>>, %arg3: memref<1x4xf32, #tpu.memory_space<vmem>>, %arg4: memref<1x4xf32, #tpu.memory_space<vmem>>, %arg5: memref<9x4x4xf32, #tpu.memory_space<vmem>>, %arg6: memref<1x4xf32, #tpu.memory_space<vmem>>, %arg7: memref<1x4xf32, #tpu.memory_space<vmem>>, %arg8: memref<4x16xf32, #tpu.memory_space<vmem>>, %arg9: memref<1x16xf32, #tpu.memory_space<vmem>>, %arg10: memref<1x16xf32, #tpu.memory_space<vmem>>, %arg11: memref<1x8x8x16xf32, #tpu.memory_space<vmem>>, %arg12: memref<10x10x4xf32, #tpu.memory_space<vmem>>, %arg13: memref<64x4xf32, #tpu.memory_space<vmem>>) attributes {dimension_semantics = [#tpu.dimension_semantics<parallel>], iteration_bounds = array<i64: 2>, scalar_prefetch = 0 : i64, scratch_operands = 2 : i64, tpu.core_type = #tpu.core_type<tc>, window_params = [{transform_indices = @transform_0, window_bounds = array<i64: 1, 8, 8, 16>}, {pipeline_mode = #tpu.pipeline_mode<synchronous>, transform_indices = @transform_1, window_bounds = array<i64: 16, 4>}, {pipeline_mode = #tpu.pipeline_mode<synchronous>, transform_indices = @transform_2, window_bounds = array<i64: 1, 4>}, {pipeline_mode = #tpu.pipeline_mode<synchronous>, transform_indices = @transform_3, window_bounds = array<i64: 1, 4>}, {pipeline_mode = #tpu.pipeline_mode<synchronous>, transform_indices = @transform_4, window_bounds = array<i64: 9, 4, 4>}, {pipeline_mode = #tpu.pipeline_mode<synchronous>, transform_indices = @transform_5, window_bounds = array<i64: 1, 4>}, {pipeline_mode = #tpu.pipeline_mode<synchronous>, transform_indices = @transform_6, window_bounds = array<i64: 1, 4>}, {pipeline_mode = #tpu.pipeline_mode<synchronous>, transform_indices = @transform_7, window_bounds = array<i64: 4, 16>}, {pipeline_mode = #tpu.pipeline_mode<synchronous>, transform_indices = @transform_8, window_bounds = array<i64: 1, 16>}, {pipeline_mode = #tpu.pipeline_mode<synchronous>, transform_indices = @transform_9, window_bounds = array<i64: 1, 16>}, {transform_indices = @transform_10, window_bounds = array<i64: 1, 8, 8, 16>}]} {
    %c0 = arith.constant 0 : index
    %c0_0 = arith.constant 0 : index
    %c0_1 = arith.constant 0 : index
    %c0_2 = arith.constant 0 : index
    %0 = vector.load %arg1[%c0, %c0_0, %c0_1, %c0_2] : memref<1x8x8x16xf32, #tpu.memory_space<vmem>>, vector<1x8x8x16xf32>
    %1 = vector.shape_cast %0 : vector<1x8x8x16xf32> to vector<8x8x16xf32>
    %2 = vector.shape_cast %1 : vector<8x8x16xf32> to vector<64x16xf32>
    %c0_3 = arith.constant 0 : index
    %c0_4 = arith.constant 0 : index
    %3 = vector.load %arg2[%c0_3, %c0_4] : memref<16x4xf32, #tpu.memory_space<vmem>>, vector<16x4xf32>
    %cst = arith.constant dense<0.000000e+00> : vector<64x4xf32>
    %4 = tpu.matmul %2, %3, %cst {dimension_numbers = #tpu.dot_dimension_numbers<[1], [0], [0], [1], [0, 0, 1, 1], [], []>} : vector<64x16xf32>, vector<16x4xf32>, vector<64x4xf32> -> vector<64x4xf32>
    %c0_5 = arith.constant 0 : index
    %c0_6 = arith.constant 0 : index
    %5 = vector.load %arg3[%c0_5, %c0_6] : memref<1x4xf32, #tpu.memory_space<vmem>>, vector<1x4xf32>
    %6 = vector.broadcast %5 : vector<1x4xf32> to vector<64x4xf32>
    %7 = arith.mulf %4, %6 : vector<64x4xf32>
    %c0_7 = arith.constant 0 : index
    %c0_8 = arith.constant 0 : index
    %8 = vector.load %arg4[%c0_7, %c0_8] : memref<1x4xf32, #tpu.memory_space<vmem>>, vector<1x4xf32>
    %9 = vector.broadcast %8 : vector<1x4xf32> to vector<64x4xf32>
    %10 = arith.addf %7, %9 : vector<64x4xf32>
    %cst_9 = arith.constant 0.000000e+00 : f32
    %11 = vector.broadcast %cst_9 : f32 to vector<64x4xf32>
    %12 = arith.maximumf %10, %11 : vector<64x4xf32>
    %cst_10 = arith.constant 0.000000e+00 : f32
    %13 = vector.broadcast %cst_10 : f32 to vector<10x10x4xf32>
    %c0_11 = arith.constant 0 : index
    %c0_12 = arith.constant 0 : index
    %c0_13 = arith.constant 0 : index
    %14 = vector.load %arg12[%c0_11, %c0_12, %c0_13] : memref<10x10x4xf32, #tpu.memory_space<vmem>>, vector<10x10x4xf32>
    tpu.vector_store %arg12[%c0_11, %c0_12, %c0_13], %13 {strides = array<i32>} : memref<10x10x4xf32, #tpu.memory_space<vmem>>, vector<10x10x4xf32>,
    %15 = vector.shape_cast %12 : vector<64x4xf32> to vector<8x8x4xf32>
    %c1 = arith.constant 1 : index
    %c1_14 = arith.constant 1 : index
    %c0_15 = arith.constant 0 : index
    %16 = vector.load %arg12[%c1, %c1_14, %c0_15] : memref<10x10x4xf32, #tpu.memory_space<vmem>>, vector<8x8x4xf32>
    tpu.vector_store %arg12[%c1, %c1_14, %c0_15], %15 {strides = array<i32>} : memref<10x10x4xf32, #tpu.memory_space<vmem>>, vector<8x8x4xf32>,
    %cst_16 = arith.constant 0.000000e+00 : f32
    %17 = vector.broadcast %cst_16 : f32 to vector<64x4xf32>
    %c0_17 = arith.constant 0 : index
    %c0_18 = arith.constant 0 : index
    %18 = vector.load %arg13[%c0_17, %c0_18] : memref<64x4xf32, #tpu.memory_space<vmem>>, vector<64x4xf32>
    tpu.vector_store %arg13[%c0_17, %c0_18], %17 {strides = array<i32>} : memref<64x4xf32, #tpu.memory_space<vmem>>, vector<64x4xf32>,
    %c0_19 = arith.constant 0 : index
    %c0_20 = arith.constant 0 : index
    %c0_21 = arith.constant 0 : index
    %19 = vector.load %arg12[%c0_19, %c0_20, %c0_21] : memref<10x10x4xf32, #tpu.memory_space<vmem>>, vector<8x8x4xf32>
    %20 = vector.shape_cast %19 : vector<8x8x4xf32> to vector<64x4xf32>
    %c0_22 = arith.constant 0 : index
    %c0_23 = arith.constant 0 : index
    %21 = vector.load %arg13[%c0_22, %c0_23] : memref<64x4xf32, #tpu.memory_space<vmem>>, vector<64x4xf32>
    %c0_24 = arith.constant 0 : index
    %c0_25 = arith.constant 0 : index
    %c0_26 = arith.constant 0 : index
    %22 = vector.load %arg5[%c0_24, %c0_25, %c0_26] : memref<9x4x4xf32, #tpu.memory_space<vmem>>, vector<1x4x4xf32>
    %23 = vector.shape_cast %22 : vector<1x4x4xf32> to vector<4x4xf32>
    %cst_27 = arith.constant dense<0.000000e+00> : vector<64x4xf32>
    %24 = tpu.matmul %20, %23, %cst_27 {dimension_numbers = #tpu.dot_dimension_numbers<[1], [0], [0], [1], [0, 0, 1, 1], [], []>} : vector<64x4xf32>, vector<4x4xf32>, vector<64x4xf32> -> vector<64x4xf32>
    %25 = arith.addf %21, %24 : vector<64x4xf32>
    %c0_28 = arith.constant 0 : index
    %c0_29 = arith.constant 0 : index
    %26 = vector.load %arg13[%c0_28, %c0_29] : memref<64x4xf32, #tpu.memory_space<vmem>>, vector<64x4xf32>
    tpu.vector_store %arg13[%c0_28, %c0_29], %25 {strides = array<i32>} : memref<64x4xf32, #tpu.memory_space<vmem>>, vector<64x4xf32>,
    %c0_30 = arith.constant 0 : index
    %c1_31 = arith.constant 1 : index
    %c0_32 = arith.constant 0 : index
    %27 = vector.load %arg12[%c0_30, %c1_31, %c0_32] : memref<10x10x4xf32, #tpu.memory_space<vmem>>, vector<8x8x4xf32>
    %28 = vector.shape_cast %27 : vector<8x8x4xf32> to vector<64x4xf32>
    %c0_33 = arith.constant 0 : index
    %c0_34 = arith.constant 0 : index
    %29 = vector.load %arg13[%c0_33, %c0_34] : memref<64x4xf32, #tpu.memory_space<vmem>>, vector<64x4xf32>
    %c1_35 = arith.constant 1 : index
    %c0_36 = arith.constant 0 : index
    %c0_37 = arith.constant 0 : index
    %30 = vector.load %arg5[%c1_35, %c0_36, %c0_37] : memref<9x4x4xf32, #tpu.memory_space<vmem>>, vector<1x4x4xf32>
    %31 = vector.shape_cast %30 : vector<1x4x4xf32> to vector<4x4xf32>
    %cst_38 = arith.constant dense<0.000000e+00> : vector<64x4xf32>
    %32 = tpu.matmul %28, %31, %cst_38 {dimension_numbers = #tpu.dot_dimension_numbers<[1], [0], [0], [1], [0, 0, 1, 1], [], []>} : vector<64x4xf32>, vector<4x4xf32>, vector<64x4xf32> -> vector<64x4xf32>
    %33 = arith.addf %29, %32 : vector<64x4xf32>
    %c0_39 = arith.constant 0 : index
    %c0_40 = arith.constant 0 : index
    %34 = vector.load %arg13[%c0_39, %c0_40] : memref<64x4xf32, #tpu.memory_space<vmem>>, vector<64x4xf32>
    tpu.vector_store %arg13[%c0_39, %c0_40], %33 {strides = array<i32>} : memref<64x4xf32, #tpu.memory_space<vmem>>, vector<64x4xf32>,
    %c0_41 = arith.constant 0 : index
    %c2 = arith.constant 2 : index
    %c0_42 = arith.constant 0 : index
    %35 = vector.load %arg12[%c0_41, %c2, %c0_42] : memref<10x10x4xf32, #tpu.memory_space<vmem>>, vector<8x8x4xf32>
    %36 = vector.shape_cast %35 : vector<8x8x4xf32> to vector<64x4xf32>
    %c0_43 = arith.constant 0 : index
    %c0_44 = arith.constant 0 : index
    %37 = vector.load %arg13[%c0_43, %c0_44] : memref<64x4xf32, #tpu.memory_space<vmem>>, vector<64x4xf32>
    %c2_45 = arith.constant 2 : index
    %c0_46 = arith.constant 0 : index
    %c0_47 = arith.constant 0 : index
    %38 = vector.load %arg5[%c2_45, %c0_46, %c0_47] : memref<9x4x4xf32, #tpu.memory_space<vmem>>, vector<1x4x4xf32>
    %39 = vector.shape_cast %38 : vector<1x4x4xf32> to vector<4x4xf32>
    %cst_48 = arith.constant dense<0.000000e+00> : vector<64x4xf32>
    %40 = tpu.matmul %36, %39, %cst_48 {dimension_numbers = #tpu.dot_dimension_numbers<[1], [0], [0], [1], [0, 0, 1, 1], [], []>} : vector<64x4xf32>, vector<4x4xf32>, vector<64x4xf32> -> vector<64x4xf32>
    %41 = arith.addf %37, %40 : vector<64x4xf32>
    %c0_49 = arith.constant 0 : index
    %c0_50 = arith.constant 0 : index
    %42 = vector.load %arg13[%c0_49, %c0_50] : memref<64x4xf32, #tpu.memory_space<vmem>>, vector<64x4xf32>
    tpu.vector_store %arg13[%c0_49, %c0_50], %41 {strides = array<i32>} : memref<64x4xf32, #tpu.memory_space<vmem>>, vector<64x4xf32>,
    %c1_51 = arith.constant 1 : index
    %c0_52 = arith.constant 0 : index
    %c0_53 = arith.constant 0 : index
    %43 = vector.load %arg12[%c1_51, %c0_52, %c0_53] : memref<10x10x4xf32, #tpu.memory_space<vmem>>, vector<8x8x4xf32>
    %44 = vector.shape_cast %43 : vector<8x8x4xf32> to vector<64x4xf32>
    %c0_54 = arith.constant 0 : index
    %c0_55 = arith.constant 0 : index
    %45 = vector.load %arg13[%c0_54, %c0_55] : memref<64x4xf32, #tpu.memory_space<vmem>>, vector<64x4xf32>
    %c3 = arith.constant 3 : index
    %c0_56 = arith.constant 0 : index
    %c0_57 = arith.constant 0 : index
    %46 = vector.load %arg5[%c3, %c0_56, %c0_57] : memref<9x4x4xf32, #tpu.memory_space<vmem>>, vector<1x4x4xf32>
    %47 = vector.shape_cast %46 : vector<1x4x4xf32> to vector<4x4xf32>
    %cst_58 = arith.constant dense<0.000000e+00> : vector<64x4xf32>
    %48 = tpu.matmul %44, %47, %cst_58 {dimension_numbers = #tpu.dot_dimension_numbers<[1], [0], [0], [1], [0, 0, 1, 1], [], []>} : vector<64x4xf32>, vector<4x4xf32>, vector<64x4xf32> -> vector<64x4xf32>
    %49 = arith.addf %45, %48 : vector<64x4xf32>
    %c0_59 = arith.constant 0 : index
    %c0_60 = arith.constant 0 : index
    %50 = vector.load %arg13[%c0_59, %c0_60] : memref<64x4xf32, #tpu.memory_space<vmem>>, vector<64x4xf32>
    tpu.vector_store %arg13[%c0_59, %c0_60], %49 {strides = array<i32>} : memref<64x4xf32, #tpu.memory_space<vmem>>, vector<64x4xf32>,
    %c1_61 = arith.constant 1 : index
    %c1_62 = arith.constant 1 : index
    %c0_63 = arith.constant 0 : index
    %51 = vector.load %arg12[%c1_61, %c1_62, %c0_63] : memref<10x10x4xf32, #tpu.memory_space<vmem>>, vector<8x8x4xf32>
    %52 = vector.shape_cast %51 : vector<8x8x4xf32> to vector<64x4xf32>
    %c0_64 = arith.constant 0 : index
    %c0_65 = arith.constant 0 : index
    %53 = vector.load %arg13[%c0_64, %c0_65] : memref<64x4xf32, #tpu.memory_space<vmem>>, vector<64x4xf32>
    %c4 = arith.constant 4 : index
    %c0_66 = arith.constant 0 : index
    %c0_67 = arith.constant 0 : index
    %54 = vector.load %arg5[%c4, %c0_66, %c0_67] : memref<9x4x4xf32, #tpu.memory_space<vmem>>, vector<1x4x4xf32>
    %55 = vector.shape_cast %54 : vector<1x4x4xf32> to vector<4x4xf32>
    %cst_68 = arith.constant dense<0.000000e+00> : vector<64x4xf32>
    %56 = tpu.matmul %52, %55, %cst_68 {dimension_numbers = #tpu.dot_dimension_numbers<[1], [0], [0], [1], [0, 0, 1, 1], [], []>} : vector<64x4xf32>, vector<4x4xf32>, vector<64x4xf32> -> vector<64x4xf32>
    %57 = arith.addf %53, %56 : vector<64x4xf32>
    %c0_69 = arith.constant 0 : index
    %c0_70 = arith.constant 0 : index
    %58 = vector.load %arg13[%c0_69, %c0_70] : memref<64x4xf32, #tpu.memory_space<vmem>>, vector<64x4xf32>
    tpu.vector_store %arg13[%c0_69, %c0_70], %57 {strides = array<i32>} : memref<64x4xf32, #tpu.memory_space<vmem>>, vector<64x4xf32>,
    %c1_71 = arith.constant 1 : index
    %c2_72 = arith.constant 2 : index
    %c0_73 = arith.constant 0 : index
    %59 = vector.load %arg12[%c1_71, %c2_72, %c0_73] : memref<10x10x4xf32, #tpu.memory_space<vmem>>, vector<8x8x4xf32>
    %60 = vector.shape_cast %59 : vector<8x8x4xf32> to vector<64x4xf32>
    %c0_74 = arith.constant 0 : index
    %c0_75 = arith.constant 0 : index
    %61 = vector.load %arg13[%c0_74, %c0_75] : memref<64x4xf32, #tpu.memory_space<vmem>>, vector<64x4xf32>
    %c5 = arith.constant 5 : index
    %c0_76 = arith.constant 0 : index
    %c0_77 = arith.constant 0 : index
    %62 = vector.load %arg5[%c5, %c0_76, %c0_77] : memref<9x4x4xf32, #tpu.memory_space<vmem>>, vector<1x4x4xf32>
    %63 = vector.shape_cast %62 : vector<1x4x4xf32> to vector<4x4xf32>
    %cst_78 = arith.constant dense<0.000000e+00> : vector<64x4xf32>
    %64 = tpu.matmul %60, %63, %cst_78 {dimension_numbers = #tpu.dot_dimension_numbers<[1], [0], [0], [1], [0, 0, 1, 1], [], []>} : vector<64x4xf32>, vector<4x4xf32>, vector<64x4xf32> -> vector<64x4xf32>
    %65 = arith.addf %61, %64 : vector<64x4xf32>
    %c0_79 = arith.constant 0 : index
    %c0_80 = arith.constant 0 : index
    %66 = vector.load %arg13[%c0_79, %c0_80] : memref<64x4xf32, #tpu.memory_space<vmem>>, vector<64x4xf32>
    tpu.vector_store %arg13[%c0_79, %c0_80], %65 {strides = array<i32>} : memref<64x4xf32, #tpu.memory_space<vmem>>, vector<64x4xf32>,
    %c2_81 = arith.constant 2 : index
    %c0_82 = arith.constant 0 : index
    %c0_83 = arith.constant 0 : index
    %67 = vector.load %arg12[%c2_81, %c0_82, %c0_83] : memref<10x10x4xf32, #tpu.memory_space<vmem>>, vector<8x8x4xf32>
    %68 = vector.shape_cast %67 : vector<8x8x4xf32> to vector<64x4xf32>
    %c0_84 = arith.constant 0 : index
    %c0_85 = arith.constant 0 : index
    %69 = vector.load %arg13[%c0_84, %c0_85] : memref<64x4xf32, #tpu.memory_space<vmem>>, vector<64x4xf32>
    %c6 = arith.constant 6 : index
    %c0_86 = arith.constant 0 : index
    %c0_87 = arith.constant 0 : index
    %70 = vector.load %arg5[%c6, %c0_86, %c0_87] : memref<9x4x4xf32, #tpu.memory_space<vmem>>, vector<1x4x4xf32>
    %71 = vector.shape_cast %70 : vector<1x4x4xf32> to vector<4x4xf32>
    %cst_88 = arith.constant dense<0.000000e+00> : vector<64x4xf32>
    %72 = tpu.matmul %68, %71, %cst_88 {dimension_numbers = #tpu.dot_dimension_numbers<[1], [0], [0], [1], [0, 0, 1, 1], [], []>} : vector<64x4xf32>, vector<4x4xf32>, vector<64x4xf32> -> vector<64x4xf32>
    %73 = arith.addf %69, %72 : vector<64x4xf32>
    %c0_89 = arith.constant 0 : index
    %c0_90 = arith.constant 0 : index
    %74 = vector.load %arg13[%c0_89, %c0_90] : memref<64x4xf32, #tpu.memory_space<vmem>>, vector<64x4xf32>
    tpu.vector_store %arg13[%c0_89, %c0_90], %73 {strides = array<i32>} : memref<64x4xf32, #tpu.memory_space<vmem>>, vector<64x4xf32>,
    %c2_91 = arith.constant 2 : index
    %c1_92 = arith.constant 1 : index
    %c0_93 = arith.constant 0 : index
    %75 = vector.load %arg12[%c2_91, %c1_92, %c0_93] : memref<10x10x4xf32, #tpu.memory_space<vmem>>, vector<8x8x4xf32>
    %76 = vector.shape_cast %75 : vector<8x8x4xf32> to vector<64x4xf32>
    %c0_94 = arith.constant 0 : index
    %c0_95 = arith.constant 0 : index
    %77 = vector.load %arg13[%c0_94, %c0_95] : memref<64x4xf32, #tpu.memory_space<vmem>>, vector<64x4xf32>
    %c7 = arith.constant 7 : index
    %c0_96 = arith.constant 0 : index
    %c0_97 = arith.constant 0 : index
    %78 = vector.load %arg5[%c7, %c0_96, %c0_97] : memref<9x4x4xf32, #tpu.memory_space<vmem>>, vector<1x4x4xf32>
    %79 = vector.shape_cast %78 : vector<1x4x4xf32> to vector<4x4xf32>
    %cst_98 = arith.constant dense<0.000000e+00> : vector<64x4xf32>
    %80 = tpu.matmul %76, %79, %cst_98 {dimension_numbers = #tpu.dot_dimension_numbers<[1], [0], [0], [1], [0, 0, 1, 1], [], []>} : vector<64x4xf32>, vector<4x4xf32>, vector<64x4xf32> -> vector<64x4xf32>
    %81 = arith.addf %77, %80 : vector<64x4xf32>
    %c0_99 = arith.constant 0 : index
    %c0_100 = arith.constant 0 : index
    %82 = vector.load %arg13[%c0_99, %c0_100] : memref<64x4xf32, #tpu.memory_space<vmem>>, vector<64x4xf32>
    tpu.vector_store %arg13[%c0_99, %c0_100], %81 {strides = array<i32>} : memref<64x4xf32, #tpu.memory_space<vmem>>, vector<64x4xf32>,
    %c2_101 = arith.constant 2 : index
    %c2_102 = arith.constant 2 : index
    %c0_103 = arith.constant 0 : index
    %83 = vector.load %arg12[%c2_101, %c2_102, %c0_103] : memref<10x10x4xf32, #tpu.memory_space<vmem>>, vector<8x8x4xf32>
    %84 = vector.shape_cast %83 : vector<8x8x4xf32> to vector<64x4xf32>
    %c0_104 = arith.constant 0 : index
    %c0_105 = arith.constant 0 : index
    %85 = vector.load %arg13[%c0_104, %c0_105] : memref<64x4xf32, #tpu.memory_space<vmem>>, vector<64x4xf32>
    %c8 = arith.constant 8 : index
    %c0_106 = arith.constant 0 : index
    %c0_107 = arith.constant 0 : index
    %86 = vector.load %arg5[%c8, %c0_106, %c0_107] : memref<9x4x4xf32, #tpu.memory_space<vmem>>, vector<1x4x4xf32>
    %87 = vector.shape_cast %86 : vector<1x4x4xf32> to vector<4x4xf32>
    %cst_108 = arith.constant dense<0.000000e+00> : vector<64x4xf32>
    %88 = tpu.matmul %84, %87, %cst_108 {dimension_numbers = #tpu.dot_dimension_numbers<[1], [0], [0], [1], [0, 0, 1, 1], [], []>} : vector<64x4xf32>, vector<4x4xf32>, vector<64x4xf32> -> vector<64x4xf32>
    %89 = arith.addf %85, %88 : vector<64x4xf32>
    %c0_109 = arith.constant 0 : index
    %c0_110 = arith.constant 0 : index
    %90 = vector.load %arg13[%c0_109, %c0_110] : memref<64x4xf32, #tpu.memory_space<vmem>>, vector<64x4xf32>
    tpu.vector_store %arg13[%c0_109, %c0_110], %89 {strides = array<i32>} : memref<64x4xf32, #tpu.memory_space<vmem>>, vector<64x4xf32>,
    %c0_111 = arith.constant 0 : index
    %c0_112 = arith.constant 0 : index
    %91 = vector.load %arg13[%c0_111, %c0_112] : memref<64x4xf32, #tpu.memory_space<vmem>>, vector<64x4xf32>
    %c0_113 = arith.constant 0 : index
    %c0_114 = arith.constant 0 : index
    %92 = vector.load %arg6[%c0_113, %c0_114] : memref<1x4xf32, #tpu.memory_space<vmem>>, vector<1x4xf32>
    %93 = vector.broadcast %92 : vector<1x4xf32> to vector<64x4xf32>
    %94 = arith.mulf %91, %93 : vector<64x4xf32>
    %c0_115 = arith.constant 0 : index
    %c0_116 = arith.constant 0 : index
    %95 = vector.load %arg7[%c0_115, %c0_116] : memref<1x4xf32, #tpu.memory_space<vmem>>, vector<1x4xf32>
    %96 = vector.broadcast %95 : vector<1x4xf32> to vector<64x4xf32>
    %97 = arith.addf %94, %96 : vector<64x4xf32>
    %cst_117 = arith.constant 0.000000e+00 : f32
    %98 = vector.broadcast %cst_117 : f32 to vector<64x4xf32>
    %99 = arith.maximumf %97, %98 : vector<64x4xf32>
    %c0_118 = arith.constant 0 : index
    %c0_119 = arith.constant 0 : index
    %100 = vector.load %arg8[%c0_118, %c0_119] : memref<4x16xf32, #tpu.memory_space<vmem>>, vector<4x16xf32>
    %cst_120 = arith.constant dense<0.000000e+00> : vector<64x16xf32>
    %101 = tpu.matmul %99, %100, %cst_120 {dimension_numbers = #tpu.dot_dimension_numbers<[1], [0], [0], [1], [0, 0, 1, 1], [], []>} : vector<64x4xf32>, vector<4x16xf32>, vector<64x16xf32> -> vector<64x16xf32>
    %c0_121 = arith.constant 0 : index
    %c0_122 = arith.constant 0 : index
    %102 = vector.load %arg9[%c0_121, %c0_122] : memref<1x16xf32, #tpu.memory_space<vmem>>, vector<1x16xf32>
    %103 = vector.broadcast %102 : vector<1x16xf32> to vector<64x16xf32>
    %104 = arith.mulf %101, %103 : vector<64x16xf32>
    %c0_123 = arith.constant 0 : index
    %c0_124 = arith.constant 0 : index
    %105 = vector.load %arg10[%c0_123, %c0_124] : memref<1x16xf32, #tpu.memory_space<vmem>>, vector<1x16xf32>
    %106 = vector.broadcast %105 : vector<1x16xf32> to vector<64x16xf32>
    %107 = arith.addf %104, %106 : vector<64x16xf32>
    %cst_125 = arith.constant 0.000000e+00 : f32
    %108 = vector.broadcast %cst_125 : f32 to vector<64x16xf32>
    %109 = arith.maximumf %107, %108 : vector<64x16xf32>
    %110 = arith.addf %109, %2 : vector<64x16xf32>
    %cst_126 = arith.constant 0.000000e+00 : f32
    %111 = vector.broadcast %cst_126 : f32 to vector<64x16xf32>
    %112 = arith.maximumf %110, %111 : vector<64x16xf32>
    %113 = vector.shape_cast %112 : vector<64x16xf32> to vector<8x8x16xf32>
    %c0_127 = arith.constant 0 : index
    %c0_128 = arith.constant 0 : index
    %c0_129 = arith.constant 0 : index
    %c0_130 = arith.constant 0 : index
    %114 = vector.load %arg11[%c0_127, %c0_128, %c0_129, %c0_130] : memref<1x8x8x16xf32, #tpu.memory_space<vmem>>, vector<1x8x8x16xf32>
    %115 = vector.shape_cast %114 : vector<1x8x8x16xf32> to vector<8x8x16xf32>
    %116 = vector.shape_cast %113 : vector<8x8x16xf32> to vector<1x8x8x16xf32>
    tpu.vector_store %arg11[%c0_127, %c0_128, %c0_129, %c0_130], %116 {strides = array<i32>} : memref<1x8x8x16xf32, #tpu.memory_space<vmem>>, vector<1x8x8x16xf32>,
    return
  }
  func.func @transform_0(%arg0: i32) -> (i32, i32, i32, i32) {
    %c0_i32 = arith.constant 0 : i32
    %c0_i32_0 = arith.constant 0 : i32
    %c0_i32_1 = arith.constant 0 : i32
    %c0_i32_2 = arith.constant 0 : i32
    return %arg0, %c0_i32, %c0_i32_0, %c0_i32_1 : i32, i32, i32, i32
  }
  func.func @transform_1(%arg0: i32) -> (i32, i32) {
    %c0_i32 = arith.constant 0 : i32
    %c0_i32_0 = arith.constant 0 : i32
    %c0_i32_1 = arith.constant 0 : i32
    return %c0_i32, %c0_i32_0 : i32, i32
  }
  func.func @transform_2(%arg0: i32) -> (i32, i32) {
    %c0_i32 = arith.constant 0 : i32
    %c0_i32_0 = arith.constant 0 : i32
    %c0_i32_1 = arith.constant 0 : i32
    return %c0_i32, %c0_i32_0 : i32, i32
  }
  func.func @transform_3(%arg0: i32) -> (i32, i32) {
    %c0_i32 = arith.constant 0 : i32
    %c0_i32_0 = arith.constant 0 : i32
    %c0_i32_1 = arith.constant 0 : i32
    return %c0_i32, %c0_i32_0 : i32, i32
  }
  func.func @transform_4(%arg0: i32) -> (i32, i32, i32) {
    %c0_i32 = arith.constant 0 : i32
    %c0_i32_0 = arith.constant 0 : i32
    %c0_i32_1 = arith.constant 0 : i32
    %c0_i32_2 = arith.constant 0 : i32
    return %c0_i32, %c0_i32_0, %c0_i32_1 : i32, i32, i32
  }
  func.func @transform_5(%arg0: i32) -> (i32, i32) {
    %c0_i32 = arith.constant 0 : i32
    %c0_i32_0 = arith.constant 0 : i32
    %c0_i32_1 = arith.constant 0 : i32
    return %c0_i32, %c0_i32_0 : i32, i32
  }
  func.func @transform_6(%arg0: i32) -> (i32, i32) {
    %c0_i32 = arith.constant 0 : i32
    %c0_i32_0 = arith.constant 0 : i32
    %c0_i32_1 = arith.constant 0 : i32
    return %c0_i32, %c0_i32_0 : i32, i32
  }
  func.func @transform_7(%arg0: i32) -> (i32, i32) {
    %c0_i32 = arith.constant 0 : i32
    %c0_i32_0 = arith.constant 0 : i32
    %c0_i32_1 = arith.constant 0 : i32
    return %c0_i32, %c0_i32_0 : i32, i32
  }
  func.func @transform_8(%arg0: i32) -> (i32, i32) {
    %c0_i32 = arith.constant 0 : i32
    %c0_i32_0 = arith.constant 0 : i32
    %c0_i32_1 = arith.constant 0 : i32
    return %c0_i32, %c0_i32_0 : i32, i32
  }
  func.func @transform_9(%arg0: i32) -> (i32, i32) {
    %c0_i32 = arith.constant 0 : i32
    %c0_i32_0 = arith.constant 0 : i32
    %c0_i32_1 = arith.constant 0 : i32
    return %c0_i32, %c0_i32_0 : i32, i32
  }
  func.func @transform_10(%arg0: i32) -> (i32, i32, i32, i32) {
    %c0_i32 = arith.constant 0 : i32
    %c0_i32_0 = arith.constant 0 : i32
    %c0_i32_1 = arith.constant 0 : i32
    %c0_i32_2 = arith.constant 0 : i32
    return %arg0, %c0_i32, %c0_i32_0, %c0_i32_1 : i32, i32, i32, i32
  }
}

</mosaic_0001>

<bundles_post_ra>
// kernel: tpu_custom_call.1
= control target key start
LH: loop header
LB: loop body
LE: loop exit
PB: predicated region body
PF: predicated region fallthrough
CT: control target
= control target key end

     0   :  { %15 = vsyncpa [#allocation5], 0  ;;  %s2601_s0 = inlined_call_operand.hbm [shape: f32[2,8,8,16], index: 0, kind: input, shape index: {}]   ;;  %s2602_s1 = inlined_call_operand.vmem [shape: f32[16,4], index: 1, kind: input, shape index: {}]   ;;  %s2603_s2 = inlined_call_operand.vmem [shape: f32[1,4], index: 2, kind: input, shape index: {}]   ;;  %s2604_s3 = inlined_call_operand.vmem [shape: f32[1,4], index: 3, kind: input, shape index: {}]   ;;  %s2605_s4 = inlined_call_operand.vmem [shape: f32[9,4,4], index: 4, kind: input, shape index: {}]   ;;  %s2606_s5 = inlined_call_operand.vmem [shape: f32[1,4], index: 5, kind: input, shape index: {}]   ;;  %s2607_s6 = inlined_call_operand.vmem [shape: f32[1,4], index: 6, kind: input, shape index: {}]   ;;  %s2608_s7 = inlined_call_operand.vmem [shape: f32[4,16], index: 7, kind: input, shape index: {}]   ;;  %s2609_s8 = inlined_call_operand.vmem [shape: f32[1,16], index: 8, kind: input, shape index: {}]   ;;  %s2610_s9 = inlined_call_operand.vmem [shape: f32[1,16], index: 9, kind: input, shape index: {}]   ;;  %s2611_s10 = inlined_call_operand.hbm [shape: f32[2,8,8,16], index: 10, kind: output, shape index: {}]  }
   0x1   :  { %17 = vsyncpa [#allocation5 + $0x1], 0 }
   0x2   :  { %18 = vsyncpa [#allocation6], 0 }
   0x3   :  { %20 = vsyncpa [#allocation6 + $0x1], 0  ;;  %s2048_s13 = smov 0   ;;  %s2050_s14 = smov 0  }
   0x4   :  { %s2052_s15 = smov 0   ;;  %s2054_s16 = smov 0  }
   0x5 LB: > { %2616 = sst [smem:[#allocation10_spill]] %s1982_s15  ;;  %s2069_s17 = sadd.s32 4294967295, %s1986_s16   ;;  %s1986_s16 = sphi %s2054_s16, %s2627_s16   ;;  %s1982_s15 = sphi %s2052_s15, %s2629_s15   ;;  %s1978_s14 = sphi %s2050_s14, %s2631_s14   ;;  %s1974_s13 = sphi %s2048_s13, %s2630_s13  }
   0x6   : > { %s1700_s18 = sadd.s32 4294967294, %s1986_s16   ;;  %s2073_s19 = sadd.s32 1, %s1986_s16  }
   0x7   : > { %2617 = sst [smem:[#allocation11_spill]] %s2073_s19  ;;  %s33_s20 = sadd.s32 1, %s1982_s15 }
   0x8   : > { %s30_s21 = ssub.s32 %s1986_s16, %s2073_s19  ;;  %p40_p0 = scmp.ne.s32.totalorder %s1982_s15, %s1978_s14 }
   0x9   : > { %p31_p1 = scmp.eq.s32.totalorder %s30_s21, 0  ;;  %p41_p2 = scmp.eq.s32.totalorder %s1986_s16, 0 }
   0xa   : > { %p46_p3 = scmp.ne.s32.totalorder %s1978_s14, %s1974_s13  ;;  %p47_p4 = scmp.eq.s32.totalorder %s2069_s17, 0 }
   0xb   : > { %s2085_s22 = scalar_select %p31_p1, %s1982_s15, %s33_s20  }
   0xc   : > { %p2087_p5 = por %p41_p2, %p40_p0  ;;  %p2091_p6 = por %p47_p4, %p46_p3 }
   0xd   : > { %2618 = sst [smem:[#allocation12_spill]] %s2085_s22  ;;  %p259_p7 = scmp.eq.s32.totalorder %s2069_s17, 1 }
   0xe   : > { %p265_p8 = scmp.eq.s32.totalorder %s1700_s18, 1  ;;  %p1837_p10 = scmp.lt.s32.totalorder %s1986_s16, 2 }
   0xf   : > { %p2098_p11 = por %p259_p7, %p40_p0  ;;  %s312_s27 = sand.u32 1, %s1982_s15  }
  0x10   : > { %p2102_p12 = por %p265_p8, %p46_p3  ;;  %s1820_s28 = sshll.u32 %s1986_s16, 6 }
  0x11   : > { %s1703_s29 = sshll.u32 %s312_s27, 6  ;;  %s321_s12 = scalar_lea.hbm %s2601_s0, %s1820_s28 }
  0x12   : > { %s2622_s26 = scalar_select %p2102_p12, 1, 0 }
  0x13   : > { %s322_s20 = sshll.u32 %s321_s12, 4  ;;  %s316_s18 = scalar_lea.vmem [#allocation4], %s1703_s29  ;;  %s323_s20 = int_to_ptr.hbm [resolvable:$true] %s322_s20 }
  0x14   : > { %2623 = sst [smem:[#allocation13_spill]] %s2622_s26  ;;  %s324_s21 = sshll.u32 %s316_s18, 4  ;;  %s325_s21 = int_to_ptr.vmem [resolvable:$true] %s324_s21 }
  0x15   : > { %p2113_p13 = pnand %p1837_p10, %p2087_p5  ;;  %p1706_p0 = scmp.ge.s32.totalorder %s1986_s16, 1 }
  0x16   : > { %p332_p1 = scmp.lt.s32.totalorder %s1986_s16, 3  ;;  %s313_s15 = scalar_lea.sflag [#allocation5], %s312_s27 }
  0x17   : > { %s1890_s19 = sshra.s32 %s323_s20, 4  ;;  %p1894_p3 = pneg %p2113_p13  ;;  %s1891_s19 = int_to_ptr.hbm [resolvable:$true] %s1890_s19 }
  0x18   : > { %s1892_s26 = scalar_lea.hbm %s1891_s19, 64  ;;  %s1897_s23 = scalar_lea.hbm %s2601_s0, 128 }
  0x19   : > { %p1893_p2 = scmp.ne.s32.totalorder %s1891_s19, %s1892_s26  ;;  %p1898_p5 = scmp.lt.s32.totalorder %s1891_s19, %s2601_s0 }
  0x1a   : > { %p1899_p8 = scmp.lt.s32.totalorder %s1897_s23, %s1892_s26 }
  0x1b   : > { %p1895_p4 = pnand %p1894_p3, %p1893_p2 }
  0x1c   : > { %p1900_p10 = por %p1899_p8, %p1898_p5 }
  0x1d   : > { %p1896_p7 = pneg %p1895_p4 }
  0x1f   : > { %p1901_p9 = pnand %p1900_p10, %p1896_p7 }
  0x21   : > { %1904 = shalt.err (!%p1901_p9)
}
  0x22   : > { %s1988_s27 = smov 128   ;;  %s1989_s12 = smov 8  }
  0x23   : > { %1832 = dma.hbm_to_vmem [thread:$0]  (!%p2113_p13), %s323_s20, 1024, %s325_s21, %s313_s15, %s1988_s27, %s1988_s27, %s1989_s12  }
  0x24   : > { %p333_p2 = pnand %p1706_p0, %p332_p1 }
  0x25   : > { %s2134_s18 = sand.u32 (!%p333_p2), 1, %s1978_s14  }
  0x26   : > { %336 = sbr.rel (%p333_p2) target bundleno = 662 (0x296), region = 60  ;;  %s1707_s19 = sshll.u32 (!%p333_p2), %s2134_s18, 6 }
  0x27   : > { %s339_s26 = scalar_lea.sflag (!%p333_p2), [#allocation5], %s2134_s18  ;;  %s2140_s28 = scalar_lea.vmem (!%p333_p2), [#allocation4], %s1707_s19 }
  0x2b   : > { %1965 = dma.done.wait (%p2091_p6), %s339_s26, 1024  }
  0x2c   : > { %1967 = vsyncadd (%p2091_p6), %s339_s26, 4294966272  ;;  %v389_v0 = vld [vmem:[%s2602_s1 + $0x8] sm:$0xff]  ;;  %v388_v1 = vld [vmem:[%s2602_s1] sm:$0xff]  ;;  %vm390_vm0 = vcmask 130048   ;;  %vm568_vm1 = vcmask 1043456   ;;  %vm488_vm2 = vcmask 31744  }
  0x2d   : > { %429 = vmatpush.msra.mxu0 %v389_v0  ;;  %v380_v2 = vld [vmem:[%s2140_s28] sm:$0xff]  ;;  %v381_v3 = vld [vmem:[%s2140_s28 + $0x8] sm:$0xff]  ;;  %v382_v4 = vld [vmem:[%s2140_s28 + $0x10] sm:$0xff]  ;;  %v1990_v11 = vmov 0.0   ;;  %vm490_vm3 = vcmask 25600   ;;  %s2542_s15 = scalar_lea.vmem [#allocation7], %s1707_s19 }
  0x2e   : > { %v383_v5 = vld [vmem:[%s2140_s28 + $0x18] sm:$0xff]  ;;  %v543_v6 = vld [vmem:[%s2605_s4] sm:$0xf]  ;;  %v385_v8 = vld [vmem:[%s2140_s28 + $0x28] sm:$0xff]  ;;  %492 = vst.msk [vmem:[#allocation2 + $0x10] sm:$0xff] %vm488_vm2, %v1990_v11  ;;  %s1821_s19 = sshll.u32 %s2069_s17, 6 }
  0x2f   : > { %430 = vmatpush.msra.mxu0 %v388_v1  ;;  %1822 = vmatpush.msk.msra.mxu1 %vm568_vm1, %v543_v6  ;;  %v384_v7 = vld [vmem:[%s2140_s28 + $0x20] sm:$0xff]  ;;  %v386_v9 = vld [vmem:[%s2140_s28 + $0x30] sm:$0xff]  ;;  %v387_v10 = vld [vmem:[%s2140_s28 + $0x38] sm:$0xff]  ;;  %489 = vst.msk [vmem:[#allocation2] sm:$0xff] %vm488_vm2, %v1990_v11  ;;  %s1623_s21 = scalar_lea.hbm %s2611_s10, %s1821_s19  ;;  %s1624_s24 = sshll.u32 %s2542_s15, 4  ;;  %s1625_s24 = int_to_ptr.vmem [resolvable:$true] %s1624_s24 }
  0x30   : > { %1709 = vmatmul.msk.f32.vlgmr.msra.gmra.mxu0 %vm390_vm0, %v380_v2  ;;  %494 = vst.msk [vmem:[#allocation2 + $0x20] sm:$0xff] %vm488_vm2, %v1990_v11  ;;  %v1726_v13 = vld [vmem:[%s2605_s4 + $0x4] sm:$0xf]  ;;  %v1736_v14 = vld [vmem:[%s2605_s4 + $0x8] sm:$0xf]  ;;  %s1626_s29 = sshll.u32 %s1623_s21, 4  ;;  %s1627_s29 = int_to_ptr.hbm [resolvable:$true] %s1626_s29 }
  0x31   : > { %1717 = vmatpush.msk.msrb.mxu0 %vm568_vm1, %v543_v6  ;;  %496 = vst.msk [vmem:[#allocation2 + $0x30] sm:$0xff] %vm488_vm2, %v1990_v11  ;;  %1823 = vmatpush.msk.msra.mxu2 %vm568_vm1, %v1726_v13  ;;  %v1746_v15 = vld [vmem:[%s2605_s4 + $0xc] sm:$0xf]  ;;  %v2219_v16 = vld [vmem:[%s2603_s2] ss:$0 sm:$0xff]  ;;  %s1612_s17 = scalar_lea.sflag [#allocation6], %s2134_s18 }
  0x32   : > { %498 = vst.msk [vmem:[#allocation2 + $0x40] sm:$0xff] %vm488_vm2, %v1990_v11  ;;  %1824 = vmatpush.msk.msra.mxu3 %vm568_vm1, %v1736_v14  ;;  %1747 = vmatpush.msk.msrb.mxu1 %vm568_vm1, %v1746_v15  ;;  %v2224_v17 = vld [vmem:[%s2604_s3] ss:$0 sm:$0xff]  ;;  %v1756_v18 = vld [vmem:[%s2605_s4 + $0x10] sm:$0xf]  ;;  %s1934_s23 = sshra.s32 %s1627_s29, 4  ;;  %s1935_s23 = int_to_ptr.hbm [resolvable:$true] %s1934_s23 }
  0x33   : > { %500 = vst.msk [vmem:[#allocation2 + $0x50] sm:$0xff] %vm488_vm2, %v1990_v11  ;;  %1727 = vmatpush.msk.msra.mxu0 %vm568_vm1, %v1726_v13  ;;  %1757 = vmatpush.msk.msrb.mxu2 %vm568_vm1, %v1756_v18  ;;  %v1776_v36 = vld [vmem:[%s2605_s4 + $0x18] sm:$0xf]  ;;  %v1766_v38 = vld [vmem:[%s2605_s4 + $0x14] sm:$0xf]  ;;  %s1936_s30 = scalar_lea.hbm %s1935_s23, 64  ;;  %p1941_p0 = scmp.lt.s32.totalorder %s1935_s23, %s2611_s10 }
  0x34   : > { %502 = vst.msk [vmem:[#allocation2 + $0x60] sm:$0xff] %vm488_vm2, %v1990_v11  ;;  %1767 = vmatpush.msk.msrb.mxu3 %vm568_vm1, %v1766_v38  ;;  %v1786_v55 = vld [vmem:[%s2605_s4 + $0x1c] sm:$0xf]  ;;  %v1796_v56 = vld [vmem:[%s2605_s4 + $0x20] sm:$0xf]  ;;  %p1937_p6 = scmp.ne.s32.totalorder %s1935_s23, %s1936_s30  ;;  %s1940_s12 = scalar_lea.hbm %s2611_s10, 128 }
  0x35   : > { %493 = vst.msk [vmem:[#allocation2 + $0x18] sm:$0x3] %vm490_vm3, %v1990_v11  ;;  %p1942_p1 = scmp.lt.s32.totalorder %s1940_s12, %s1936_s30 }
  0x36   : > { %491 = vst.msk [vmem:[#allocation2 + $0x8] sm:$0x3] %vm490_vm3, %v1990_v11  ;;  %v527_v12 = vld [vmem:[#allocation2] sm:$0xff]  ;;  %p1938_p9 = pnand %p1937_p6, %p2098_p11 }
  0x37   : > { %495 = vst.msk [vmem:[#allocation2 + $0x28] sm:$0x3] %vm490_vm3, %v1990_v11  ;;  %p1943_p3 = por %p1942_p1, %p1941_p0 }
  0x38   : > { %1710 = vmatmul.msk.f32.gmra.mxu0 %vm390_vm0, %v381_v3  ;;  %497 = vst.msk [vmem:[#allocation2 + $0x38] sm:$0x3] %vm490_vm3, %v1990_v11  ;;  %p1939_p13 = pneg %p1938_p9 }
  0x39   : > { %499 = vst.msk [vmem:[#allocation2 + $0x48] sm:$0x3] %vm490_vm3, %v1990_v11 }
  0x3a   : > { %501 = vst.msk [vmem:[#allocation2 + $0x58] sm:$0x3] %vm490_vm3, %v1990_v11  ;;  %p1944_p4 = pnand %p1943_p3, %p1939_p13 }
  0x3b   : > { %503 = vst.msk [vmem:[#allocation2 + $0x68] sm:$0x3] %vm490_vm3, %v1990_v11 }
  0x3c   : > { %504 = vst.msk [vmem:[#allocation2 + $0x70] sm:$0xff] %vm488_vm2, %v1990_v11 }
  0x3d   : > { %505 = vst.msk [vmem:[#allocation2 + $0x78] sm:$0x3] %vm490_vm3, %v1990_v11  ;;  %v629_v31 = vld [vmem:[#allocation2 + $0x1] sm:$0xff] }
  0x3e   : > { %506 = vst.msk [vmem:[#allocation2 + $0x80] sm:$0xff] %vm488_vm2, %v1990_v11  ;;  %v731_v49 = vld [vmem:[#allocation2 + $0x2] sm:$0xff] }
  0x3f   : > { %507 = vst.msk [vmem:[#allocation2 + $0x88] sm:$0x3] %vm490_vm3, %v1990_v11 }
  0x40   : > { %1711 = vmatmul.msk.f32.gmra.mxu0 %vm390_vm0, %v382_v4  ;;  %508 = vst.msk [vmem:[#allocation2 + $0x90] sm:$0xff] %vm488_vm2, %v1990_v11 }
  0x41   : > { %509 = vst.msk [vmem:[#allocation2 + $0x98] sm:$0x3] %vm490_vm3, %v1990_v11 }
  0x42   : > { %519 = vst.msk [vmem:[#allocation3] sm:$0xff] %vm488_vm2, %v1990_v11 }
  0x43   : > { %520 = vst.msk [vmem:[#allocation3 + $0x8] sm:$0xff] %vm488_vm2, %v1990_v11 }
  0x44   : > { %521 = vst.msk [vmem:[#allocation3 + $0x10] sm:$0xff] %vm488_vm2, %v1990_v11 }
  0x45   : > { %522 = vst.msk [vmem:[#allocation3 + $0x18] sm:$0xff] %vm488_vm2, %v1990_v11 }
  0x46   : > { %523 = vst.msk [vmem:[#allocation3 + $0x20] sm:$0xff] %vm488_vm2, %v1990_v11 }
  0x47   : > { %524 = vst.msk [vmem:[#allocation3 + $0x28] sm:$0xff] %vm488_vm2, %v1990_v11 }
  0x48   : > { %1712 = vmatmul.msk.f32.gmra.mxu0 %vm390_vm0, %v383_v5  ;;  %525 = vst.msk [vmem:[#allocation3 + $0x30] sm:$0xff] %vm488_vm2, %v1990_v11 }
  0x49   : > { %526 = vst.msk [vmem:[#allocation3 + $0x38] sm:$0xff] %vm488_vm2, %v1990_v11 }
  0x50   : > { %1713 = vmatmul.msk.f32.gmra.mxu0 %vm390_vm0, %v384_v7 }
  0x58   : > { %1714 = vmatmul.msk.f32.gmra.mxu0 %vm390_vm0, %v385_v8 }
  0x60   : > { %1715 = vmatmul.msk.f32.gmra.mxu0 %vm390_vm0, %v386_v9 }
  0x68   : > { %1716 = vmatmul.msk.f32.gmra.mxu0 %vm390_vm0, %v387_v10 }
  0x70   : > { %1718 = vmatmul.msk.f32.vlgmr.msrb.gmra.mxu0 %vm488_vm2, %v527_v12 }
  0x71   : > { %1737 = vmatpush.msk.msrb.mxu0 %vm568_vm1, %v1736_v14  ;;  %v535_v14 = vld [vmem:[#allocation3] sm:$0xff] }
  0xad   : > { %v432_v19 = vpop.f32.mrf.mxu0 }
  0xae   : > { %v460_v20 = vmul.f32 %v2219_v16, %v432_v19 }
  0xb0   : > { %v472_v21 = vadd.f32 %v2224_v17, %v460_v20  ;;  %v1147_v20 = vld [vmem:[#allocation2 + $0x90] sm:$0xff] }
  0xb2   : > { %v480_v22 = vmax.f32 %v472_v21, 0.0  ;;  %v536_v21 = vld [vmem:[#allocation3 + $0x8] sm:$0xff] }
  0xb4   : > { %511 = vst.msk [vmem:[#allocation2 + $0x11] sm:$0xff] %vm488_vm2, %v480_v22 }
  0xb5   : > { %v435_v23 = vpop.f32.mrf.mxu0 }
  0xb6   : > { %v461_v24 = vmul.f32 %v2219_v16, %v435_v23 }
  0xb8   : > { %v473_v25 = vadd.f32 %v2224_v17, %v461_v24  ;;  %v537_v24 = vld [vmem:[#allocation3 + $0x10] sm:$0xff] }
  0xba   : > { %v481_v26 = vmax.f32 %v473_v25, 0.0 }
  0xbb   : > { %v2235_v27 = vld [vmem:[#allocation2 + $0x10] sm:$0xff] }
  0xbc   : > { %512 = vst.msk [vmem:[#allocation2 + $0x21] sm:$0xff] %vm488_vm2, %v481_v26  ;;  %1719 = vmatmul.msk.f32.gmra.mxu0 %vm488_vm2, %v2235_v27  ;;  %v630_v42 = vld [vmem:[#allocation2 + $0x11] sm:$0xff] }
  0xbd   : > { %v438_v28 = vpop.f32.mrf.mxu0  ;;  %v732_v60 = vld [vmem:[#allocation2 + $0x12] sm:$0xff] }
  0xbe   : > { %v462_v29 = vmul.f32 %v2219_v16, %v438_v28 }
  0xc0   : > { %v474_v30 = vadd.f32 %v2224_v17, %v462_v29 }
  0xc2   : > { %v482_v32 = vmax.f32 %v474_v30, 0.0  ;;  %v538_v30 = vld [vmem:[#allocation3 + $0x18] sm:$0xff] }
  0xc3   : > { %v2242_v33 = vld [vmem:[#allocation2 + $0x20] sm:$0xff] }
  0xc4   : > { %v2244_v34 = vld [vmem:[#allocation2 + $0x21] sm:$0xff]  ;;  %513 = vst.msk [vmem:[#allocation2 + $0x31] sm:$0xff] %vm488_vm2, %v482_v32  ;;  %1720 = vmatmul.msk.f32.vlgmr.msra.gmra.mxu1 %vm488_vm2, %v2242_v33  ;;  %1728 = vmatmul.msk.f32.vlgmr.msra.gmra.mxu0 %vm488_vm2, %v629_v31 }
  0xc5   : > { %v2246_v35 = vld [vmem:[#allocation2 + $0x22] sm:$0xff]  ;;  %1730 = vmatmul.msk.f32.vlgmr.msra.gmra.mxu2 %vm488_vm2, %v2244_v34  ;;  %v441_v37 = vpop.f32.mrf.mxu0  ;;  %1777 = vmatpush.msk.msra.mxu0 %vm568_vm1, %v1776_v36 }
  0xc6   : > { %1740 = vmatmul.msk.f32.vlgmr.msra.gmra.mxu3 %vm488_vm2, %v2246_v35  ;;  %v463_v39 = vmul.f32 %v2219_v16, %v441_v37  ;;  %1787 = vmatpush.msk.msra.mxu1 %vm568_vm1, %v1786_v55 }
  0xc7   : > { %1797 = vmatpush.msk.msra.mxu2 %vm568_vm1, %v1796_v56 }
  0xc8   : > { %v475_v40 = vadd.f32 %v2224_v17, %v463_v39 }
  0xca   : > { %v483_v41 = vmax.f32 %v475_v40, 0.0  ;;  %v539_v40 = vld [vmem:[#allocation3 + $0x20] sm:$0xff] }
  0xcb   : > { %v2266_v43 = vld [vmem:[#allocation2 + $0x30] sm:$0xff] }
  0xcc   : > { %v2268_v44 = vld [vmem:[#allocation2 + $0x31] sm:$0xff]  ;;  %514 = vst.msk [vmem:[#allocation2 + $0x41] sm:$0xff] %vm488_vm2, %v483_v41  ;;  %1721 = vmatmul.msk.f32.gmra.mxu1 %vm488_vm2, %v2266_v43  ;;  %1729 = vmatmul.msk.f32.gmra.mxu0 %vm488_vm2, %v630_v42 }
  0xcd   : > { %v2270_v45 = vld [vmem:[#allocation2 + $0x32] sm:$0xff]  ;;  %1731 = vmatmul.msk.f32.gmra.mxu2 %vm488_vm2, %v2268_v44  ;;  %v444_v46 = vpop.f32.mrf.mxu0 }
  0xce   : > { %1741 = vmatmul.msk.f32.gmra.mxu3 %vm488_vm2, %v2270_v45  ;;  %v464_v47 = vmul.f32 %v2219_v16, %v444_v46 }
  0xd0   : > { %v476_v48 = vadd.f32 %v2224_v17, %v464_v47 }
  0xd2   : > { %v484_v50 = vmax.f32 %v476_v48, 0.0 }
  0xd3   : > { %v531_v51 = vld [vmem:[#allocation2 + $0x40] sm:$0xff] }
  0xd4   : > { %v2282_v52 = vld [vmem:[#allocation2 + $0x41] sm:$0xff]  ;;  %515 = vst.msk [vmem:[#allocation2 + $0x51] sm:$0xff] %vm488_vm2, %v484_v50  ;;  %1722 = vmatmul.msk.f32.gmra.mxu1 %vm488_vm2, %v531_v51  ;;  %1738 = vmatmul.msk.f32.vlgmr.msrb.gmra.mxu0 %vm488_vm2, %v731_v49 }
  0xd5   : > { %v2284_v53 = vld [vmem:[#allocation2 + $0x42] sm:$0xff]  ;;  %1732 = vmatmul.msk.f32.gmra.mxu2 %vm488_vm2, %v2282_v52  ;;  %v447_v54 = vpop.f32.mrf.mxu0 }
  0xd6   : > { %1742 = vmatmul.msk.f32.gmra.mxu3 %vm488_vm2, %v2284_v53  ;;  %v465_v57 = vmul.f32 %v2219_v16, %v447_v54 }
  0xd8   : > { %v477_v58 = vadd.f32 %v2224_v17, %v465_v57 }
  0xda   : > { %v485_v59 = vmax.f32 %v477_v58, 0.0 }
  0xdb   : > { %v532_v61 = vld [vmem:[#allocation2 + $0x50] sm:$0xff] }
  0xdc   : > { %v2303_v62 = vld [vmem:[#allocation2 + $0x51] sm:$0xff]  ;;  %516 = vst.msk [vmem:[#allocation2 + $0x61] sm:$0xff] %vm488_vm2, %v485_v59  ;;  %1723 = vmatmul.msk.f32.gmra.mxu1 %vm488_vm2, %v532_v61  ;;  %1739 = vmatmul.msk.f32.gmra.mxu0 %vm488_vm2, %v732_v60 }
  0xdd   : > { %v2305_v63 = vld [vmem:[#allocation2 + $0x52] sm:$0xff]  ;;  %1733 = vmatmul.msk.f32.gmra.mxu2 %vm488_vm2, %v2303_v62  ;;  %v450_v0 = vpop.f32.mrf.mxu0 }
  0xde   : > { %1743 = vmatmul.msk.f32.gmra.mxu3 %vm488_vm2, %v2305_v63  ;;  %v466_v1 = vmul.f32 %v2219_v16, %v450_v0  ;;  %v541_v0 = vld [vmem:[#allocation3 + $0x30] sm:$0xff] }
  0xe0   : > { %v478_v2 = vadd.f32 %v2224_v17, %v466_v1 }
  0xe2   : > { %v486_v3 = vmax.f32 %v478_v2, 0.0 }
  0xe3   : > { %v533_v4 = vld [vmem:[#allocation2 + $0x60] sm:$0xff] }
  0xe4   : > { %v2316_v5 = vld [vmem:[#allocation2 + $0x61] sm:$0xff]  ;;  %517 = vst.msk [vmem:[#allocation2 + $0x71] sm:$0xff] %vm488_vm2, %v486_v3  ;;  %1724 = vmatmul.msk.f32.gmra.mxu1 %vm488_vm2, %v533_v4  ;;  %1778 = vmatmul.msk.f32.vlgmr.msra.gmra.mxu0 %vm488_vm2, %v2242_v33 }
  0xe5   : > { %v2318_v6 = vld [vmem:[#allocation2 + $0x62] sm:$0xff]  ;;  %1734 = vmatmul.msk.f32.gmra.mxu2 %vm488_vm2, %v2316_v5  ;;  %v453_v10 = vpop.f32.mrf.mxu0 }
  0xe6   : > { %1744 = vmatmul.msk.f32.gmra.mxu3 %vm488_vm2, %v2318_v6  ;;  %v467_v11 = vmul.f32 %v2219_v16, %v453_v10 }
  0xe8   : > { %v479_v12 = vadd.f32 %v2224_v17, %v467_v11 }
  0xea   : > { %v487_v13 = vmax.f32 %v479_v12, 0.0 }
  0xeb   : > { %v534_v7 = vld [vmem:[#allocation2 + $0x70] sm:$0xff] }
  0xec   : > { %v2328_v8 = vld [vmem:[#allocation2 + $0x71] sm:$0xff]  ;;  %1725 = vmatmul.msk.f32.gmra.mxu1 %vm488_vm2, %v534_v7  ;;  %1779 = vmatmul.msk.f32.gmra.mxu0 %vm488_vm2, %v2266_v43  ;;  %518 = vst.msk [vmem:[#allocation2 + $0x81] sm:$0xff] %vm488_vm2, %v487_v13 }
  0xed   : > { %v2330_v9 = vld [vmem:[#allocation2 + $0x72] sm:$0xff]  ;;  %1735 = vmatmul.msk.f32.gmra.mxu2 %vm488_vm2, %v2328_v8  ;;  %v589_v16 = vpop.f32.mrf.mxu0 }
  0xee   : > { %1745 = vmatmul.msk.f32.gmra.mxu3 %vm488_vm2, %v2330_v9  ;;  %v613_v17 = vadd.f32 %v589_v16, %v535_v14  ;;  %v1249_v13 = vld [vmem:[#allocation2 + $0x91] sm:$0xff] }
  0xf0   : > { %621 = vst.msk [vmem:[#allocation3] sm:$0xff] %vm488_vm2, %v613_v17 }
  0xf3   : > { %v840_v15 = vld [vmem:[#allocation2 + $0x80] sm:$0xff] }
  0xf4   : > { %1748 = vmatmul.msk.f32.vlgmr.msrb.gmra.mxu1 %vm488_vm2, %v2235_v27  ;;  %1780 = vmatmul.msk.f32.gmra.mxu0 %vm488_vm2, %v531_v51  ;;  %v2384_v18 = vld [vmem:[#allocation2 + $0x81] sm:$0xff] }
  0xf5   : > { %1758 = vmatmul.msk.f32.vlgmr.msrb.gmra.mxu2 %vm488_vm2, %v630_v42  ;;  %v2386_v19 = vld [vmem:[#allocation2 + $0x82] sm:$0xff] }
  0xf6   : > { %1768 = vmatmul.msk.f32.vlgmr.msrb.gmra.mxu3 %vm488_vm2, %v732_v60 }
  0xf7   : > { %v637_v25 = vld [vmem:[#allocation3] sm:$0xff] }
  0xfc   : > { %1749 = vmatmul.msk.f32.gmra.mxu1 %vm488_vm2, %v2242_v33  ;;  %1781 = vmatmul.msk.f32.gmra.mxu0 %vm488_vm2, %v532_v61 }
  0xfd   : > { %1759 = vmatmul.msk.f32.gmra.mxu2 %vm488_vm2, %v2244_v34 }
  0xfe   : > { %1769 = vmatmul.msk.f32.gmra.mxu3 %vm488_vm2, %v2246_v35 }
 0x104   : > { %1750 = vmatmul.msk.f32.gmra.mxu1 %vm488_vm2, %v2266_v43  ;;  %1782 = vmatmul.msk.f32.gmra.mxu0 %vm488_vm2, %v533_v4 }
 0x105   : > { %1760 = vmatmul.msk.f32.gmra.mxu2 %vm488_vm2, %v2268_v44 }
 0x106   : > { %1770 = vmatmul.msk.f32.gmra.mxu3 %vm488_vm2, %v2270_v45 }
 0x10c   : > { %1751 = vmatmul.msk.f32.gmra.mxu1 %vm488_vm2, %v531_v51  ;;  %1783 = vmatmul.msk.f32.gmra.mxu0 %vm488_vm2, %v534_v7 }
 0x10d   : > { %1761 = vmatmul.msk.f32.gmra.mxu2 %vm488_vm2, %v2282_v52 }
 0x10e   : > { %1771 = vmatmul.msk.f32.gmra.mxu3 %vm488_vm2, %v2284_v53 }
 0x114   : > { %1752 = vmatmul.msk.f32.gmra.mxu1 %vm488_vm2, %v532_v61  ;;  %1784 = vmatmul.msk.f32.gmra.mxu0 %vm488_vm2, %v840_v15 }
 0x115   : > { %1762 = vmatmul.msk.f32.gmra.mxu2 %vm488_vm2, %v2303_v62 }
 0x116   : > { %1772 = vmatmul.msk.f32.gmra.mxu3 %vm488_vm2, %v2305_v63 }
 0x11c   : > { %1753 = vmatmul.msk.f32.gmra.mxu1 %vm488_vm2, %v533_v4  ;;  %1785 = vmatmul.msk.f32.gmra.mxu0 %vm488_vm2, %v1147_v20 }
 0x11d   : > { %1763 = vmatmul.msk.f32.gmra.mxu2 %vm488_vm2, %v2316_v5 }
 0x11e   : > { %1773 = vmatmul.msk.f32.gmra.mxu3 %vm488_vm2, %v2318_v6 }
 0x124   : > { %1754 = vmatmul.msk.f32.gmra.mxu1 %vm488_vm2, %v534_v7 }
 0x125   : > { %1764 = vmatmul.msk.f32.gmra.mxu2 %vm488_vm2, %v2328_v8 }
 0x126   : > { %1774 = vmatmul.msk.f32.gmra.mxu3 %vm488_vm2, %v2330_v9 }
 0x12c   : > { %1755 = vmatmul.msk.f32.gmra.mxu1 %vm488_vm2, %v840_v15  ;;  %v1351_v15 = vld [vmem:[#allocation2 + $0x92] sm:$0xff] }
 0x12d   : > { %1765 = vmatmul.msk.f32.gmra.mxu2 %vm488_vm2, %v2384_v18 }
 0x12e   : > { %1775 = vmatmul.msk.f32.gmra.mxu3 %vm488_vm2, %v2386_v19 }
 0x134   : > { %1788 = vmatmul.msk.f32.vlgmr.msra.gmra.mxu1 %vm488_vm2, %v2244_v34 }
 0x135   : > { %1798 = vmatmul.msk.f32.vlgmr.msra.gmra.mxu2 %vm488_vm2, %v2246_v35 }
 0x139   : > { %v592_v22 = vpop.f32.mrf.mxu0 }
 0x13a   : > { %v614_v23 = vadd.f32 %v592_v22, %v536_v21 }
 0x13c   : > { %622 = vst.msk [vmem:[#allocation3 + $0x8] sm:$0xff] %vm488_vm2, %v614_v23  ;;  %1789 = vmatmul.msk.f32.gmra.mxu1 %vm488_vm2, %v2268_v44 }
 0x13d   : > { %1799 = vmatmul.msk.f32.gmra.mxu2 %vm488_vm2, %v2270_v45 }
 0x141   : > { %v595_v26 = vpop.f32.mrf.mxu1  ;;  %v691_v27 = vpop.f32.mrf.mxu0 }
 0x142   : > { %v615_v28 = vadd.f32 %v595_v26, %v537_v24  ;;  %v715_v29 = vadd.f32 %v691_v27, %v637_v25 }
 0x143   : > { %v638_v34 = vld [vmem:[#allocation3 + $0x8] sm:$0xff] }
 0x144   : > { %623 = vst.msk [vmem:[#allocation3 + $0x10] sm:$0xff] %vm488_vm2, %v615_v28  ;;  %1790 = vmatmul.msk.f32.gmra.mxu1 %vm488_vm2, %v2282_v52  ;;  %v540_v52 = vld [vmem:[#allocation3 + $0x28] sm:$0xff] }
 0x145   : > { %723 = vst.msk [vmem:[#allocation3] sm:$0xff] %vm488_vm2, %v715_v29  ;;  %1800 = vmatmul.msk.f32.gmra.mxu2 %vm488_vm2, %v2284_v53 }
 0x148   : > { %v697_v31 = vpop.f32.mrf.mxu2 }
 0x149   : > { %v799_v32 = vpop.f32.mrf.mxu3  ;;  %v598_v33 = vpop.f32.mrf.mxu1 }
 0x14a   : > { %v694_v35 = vpop.f32.mrf.mxu0  ;;  %v616_v36 = vadd.f32 %v598_v33, %v538_v30 }
 0x14b   : > { %v716_v37 = vadd.f32 %v694_v35, %v638_v34  ;;  %v639_v38 = vld [vmem:[#allocation3 + $0x10] sm:$0xff] }
 0x14c   : > { %v717_v39 = vadd.f32 %v697_v31, %v639_v38  ;;  %624 = vst.msk [vmem:[#allocation3 + $0x18] sm:$0xff] %vm488_vm2, %v616_v36  ;;  %1791 = vmatmul.msk.f32.gmra.mxu1 %vm488_vm2, %v2303_v62  ;;  %v739_v41 = vld [vmem:[#allocation3] sm:$0xff] }
 0x14d   : > { %724 = vst.msk [vmem:[#allocation3 + $0x8] sm:$0xff] %vm488_vm2, %v716_v37  ;;  %1801 = vmatmul.msk.f32.gmra.mxu2 %vm488_vm2, %v2305_v63  ;;  %v1486_v31 = vld [vmem:[%s2608_s7] sm:$0xf] }
 0x14e   : > { %725 = vst.msk [vmem:[#allocation3 + $0x10] sm:$0xff] %vm488_vm2, %v717_v39  ;;  %1806 = vmatpush.msk.msra.mxu3 %vm568_vm1, %v1486_v31 }
 0x150   : > { %v700_v42 = vpop.f32.mrf.mxu2 }
 0x151   : > { %v802_v43 = vpop.f32.mrf.mxu3  ;;  %v601_v44 = vpop.f32.mrf.mxu1 }
 0x152   : > { %v793_v45 = vpop.f32.mrf.mxu0  ;;  %v617_v46 = vadd.f32 %v601_v44, %v539_v40 }
 0x153   : > { %v817_v47 = vadd.f32 %v793_v45, %v739_v41  ;;  %v640_v48 = vld [vmem:[#allocation3 + $0x18] sm:$0xff] }
 0x154   : > { %v718_v49 = vadd.f32 %v700_v42, %v640_v48  ;;  %625 = vst.msk [vmem:[#allocation3 + $0x20] sm:$0xff] %vm488_vm2, %v617_v46  ;;  %1792 = vmatmul.msk.f32.gmra.mxu1 %vm488_vm2, %v2316_v5  ;;  %v740_v56 = vld [vmem:[#allocation3 + $0x8] sm:$0xff] }
 0x155   : > { %v741_v50 = vld [vmem:[#allocation3 + $0x10] sm:$0xff]  ;;  %825 = vst.msk [vmem:[#allocation3] sm:$0xff] %vm488_vm2, %v817_v47  ;;  %1802 = vmatmul.msk.f32.gmra.mxu2 %vm488_vm2, %v2318_v6 }
 0x156   : > { %v819_v51 = vadd.f32 %v799_v32, %v741_v50  ;;  %726 = vst.msk [vmem:[#allocation3 + $0x18] sm:$0xff] %vm488_vm2, %v718_v49 }
 0x158   : > { %827 = vst.msk [vmem:[#allocation3 + $0x10] sm:$0xff] %vm488_vm2, %v819_v51  ;;  %v703_v53 = vpop.f32.mrf.mxu2 }
 0x159   : > { %v805_v54 = vpop.f32.mrf.mxu3  ;;  %v604_v55 = vpop.f32.mrf.mxu1 }
 0x15a   : > { %v796_v57 = vpop.f32.mrf.mxu0  ;;  %v618_v58 = vadd.f32 %v604_v55, %v540_v52 }
 0x15b   : > { %v818_v59 = vadd.f32 %v796_v57, %v740_v56  ;;  %v641_v60 = vld [vmem:[#allocation3 + $0x20] sm:$0xff] }
 0x15c   : > { %v719_v61 = vadd.f32 %v703_v53, %v641_v60  ;;  %626 = vst.msk [vmem:[#allocation3 + $0x28] sm:$0xff] %vm488_vm2, %v618_v58  ;;  %1793 = vmatmul.msk.f32.gmra.mxu1 %vm488_vm2, %v2328_v8  ;;  %v841_v20 = vld [vmem:[#allocation3] sm:$0xff] }
 0x15d   : > { %v742_v62 = vld [vmem:[#allocation3 + $0x18] sm:$0xff]  ;;  %826 = vst.msk [vmem:[#allocation3 + $0x8] sm:$0xff] %vm488_vm2, %v818_v59  ;;  %1803 = vmatmul.msk.f32.gmra.mxu2 %vm488_vm2, %v2330_v9 }
 0x15e   : > { %v820_v63 = vadd.f32 %v802_v43, %v742_v62  ;;  %727 = vst.msk [vmem:[#allocation3 + $0x20] sm:$0xff] %vm488_vm2, %v719_v61  ;;  %v542_v9 = vld [vmem:[#allocation3 + $0x38] sm:$0xff] }
 0x15f   : > { %v843_v41 = vld [vmem:[#allocation3 + $0x10] sm:$0xff] }
 0x160   : > { %828 = vst.msk [vmem:[#allocation3 + $0x18] sm:$0xff] %vm488_vm2, %v820_v63  ;;  %v706_v1 = vpop.f32.mrf.mxu2 }
 0x161   : > { %v808_v2 = vpop.f32.mrf.mxu3  ;;  %v607_v3 = vpop.f32.mrf.mxu1 }
 0x162   : > { %v619_v4 = vadd.f32 %v607_v3, %v541_v0  ;;  %v1202_v44 = vpop.f32.mrf.mxu0 }
 0x163   : > { %v642_v5 = vld [vmem:[#allocation3 + $0x28] sm:$0xff] }
 0x164   : > { %v720_v6 = vadd.f32 %v706_v1, %v642_v5  ;;  %627 = vst.msk [vmem:[#allocation3 + $0x30] sm:$0xff] %vm488_vm2, %v619_v4  ;;  %1794 = vmatmul.msk.f32.gmra.mxu1 %vm488_vm2, %v2384_v18  ;;  %v842_v32 = vld [vmem:[#allocation3 + $0x8] sm:$0xff] }
 0x165   : > { %v743_v7 = vld [vmem:[#allocation3 + $0x20] sm:$0xff]  ;;  %1804 = vmatmul.msk.f32.gmra.mxu2 %vm488_vm2, %v2386_v19 }
 0x166   : > { %v821_v8 = vadd.f32 %v805_v54, %v743_v7  ;;  %728 = vst.msk [vmem:[#allocation3 + $0x28] sm:$0xff] %vm488_vm2, %v720_v6 }
 0x167   : > { %v844_v50 = vld [vmem:[#allocation3 + $0x18] sm:$0xff] }
 0x168   : > { %829 = vst.msk [vmem:[#allocation3 + $0x20] sm:$0xff] %vm488_vm2, %v821_v8  ;;  %v709_v10 = vpop.f32.mrf.mxu2 }
 0x169   : > { %v811_v11 = vpop.f32.mrf.mxu3  ;;  %v610_v12 = vpop.f32.mrf.mxu1 }
 0x16a   : > { %v620_v14 = vadd.f32 %v610_v12, %v542_v9  ;;  %v1205_v56 = vpop.f32.mrf.mxu0 }
 0x16b   : > { %v643_v16 = vld [vmem:[#allocation3 + $0x30] sm:$0xff] }
 0x16c   : > { %v721_v17 = vadd.f32 %v709_v10, %v643_v16  ;;  %628 = vst.msk [vmem:[#allocation3 + $0x38] sm:$0xff] %vm488_vm2, %v620_v14  ;;  %1795 = vmatmul.msk.f32.gmra.mxu1 %vm488_vm2, %v1249_v13 }
 0x16d   : > { %v744_v18 = vld [vmem:[#allocation3 + $0x28] sm:$0xff]  ;;  %1805 = vmatmul.msk.f32.gmra.mxu2 %vm488_vm2, %v1351_v15 }
 0x16e   : > { %v822_v19 = vadd.f32 %v808_v2, %v744_v18  ;;  %729 = vst.msk [vmem:[#allocation3 + $0x30] sm:$0xff] %vm488_vm2, %v721_v17 }
 0x16f   : > { %v845_v62 = vld [vmem:[#allocation3 + $0x20] sm:$0xff] }
 0x170   : > { %830 = vst.msk [vmem:[#allocation3 + $0x28] sm:$0xff] %vm488_vm2, %v822_v19  ;;  %v712_v21 = vpop.f32.mrf.mxu2 }
 0x171   : > { %v814_v22 = vpop.f32.mrf.mxu3  ;;  %v895_v23 = vpop.f32.mrf.mxu1 }
 0x172   : > { %v919_v24 = vadd.f32 %v895_v23, %v841_v20  ;;  %v1208_v6 = vpop.f32.mrf.mxu0 }
 0x173   : > { %v644_v25 = vld [vmem:[#allocation3 + $0x38] sm:$0xff] }
 0x174   : > { %v722_v26 = vadd.f32 %v712_v21, %v644_v25  ;;  %927 = vst.msk [vmem:[#allocation3] sm:$0xff] %vm488_vm2, %v919_v24 }
 0x175   : > { %v745_v27 = vld [vmem:[#allocation3 + $0x30] sm:$0xff] }
 0x176   : > { %v823_v28 = vadd.f32 %v811_v11, %v745_v27  ;;  %730 = vst.msk [vmem:[#allocation3 + $0x38] sm:$0xff] %vm488_vm2, %v722_v26 }
 0x177   : > { %v846_v10 = vld [vmem:[#allocation3 + $0x28] sm:$0xff] }
 0x178   : > { %831 = vst.msk [vmem:[#allocation3 + $0x30] sm:$0xff] %vm488_vm2, %v823_v28  ;;  %v997_v29 = vpop.f32.mrf.mxu2 }
 0x179   : > { %v1099_v30 = vpop.f32.mrf.mxu3  ;;  %v898_v33 = vpop.f32.mrf.mxu1 }
 0x17a   : > { %v920_v34 = vadd.f32 %v898_v33, %v842_v32  ;;  %v1211_v21 = vpop.f32.mrf.mxu0 }
 0x17b   : > { %v943_v35 = vld [vmem:[#allocation3] sm:$0xff] }
 0x17c   : > { %v1021_v36 = vadd.f32 %v997_v29, %v943_v35  ;;  %928 = vst.msk [vmem:[#allocation3 + $0x8] sm:$0xff] %vm488_vm2, %v920_v34 }
 0x17d   : > { %v746_v37 = vld [vmem:[#allocation3 + $0x38] sm:$0xff] }
 0x17e   : > { %v824_v38 = vadd.f32 %v814_v22, %v746_v37  ;;  %1029 = vst.msk [vmem:[#allocation3] sm:$0xff] %vm488_vm2, %v1021_v36 }
 0x17f   : > { %v847_v22 = vld [vmem:[#allocation3 + $0x30] sm:$0xff] }
 0x180   : > { %832 = vst.msk [vmem:[#allocation3 + $0x38] sm:$0xff] %vm488_vm2, %v824_v38  ;;  %v1000_v39 = vpop.f32.mrf.mxu2 }
 0x181   : > { %v1102_v40 = vpop.f32.mrf.mxu3  ;;  %v901_v42 = vpop.f32.mrf.mxu1 }
 0x182   : > { %v921_v43 = vadd.f32 %v901_v42, %v843_v41  ;;  %v1214_v36 = vpop.f32.mrf.mxu0 }
 0x183   : > { %v944_v45 = vld [vmem:[#allocation3 + $0x8] sm:$0xff] }
 0x184   : > { %v1022_v46 = vadd.f32 %v1000_v39, %v944_v45  ;;  %929 = vst.msk [vmem:[#allocation3 + $0x10] sm:$0xff] %vm488_vm2, %v921_v43 }
 0x185   : > { %v1045_v47 = vld [vmem:[#allocation3] sm:$0xff] }
 0x186   : > { %v1123_v48 = vadd.f32 %v1099_v30, %v1045_v47  ;;  %1030 = vst.msk [vmem:[#allocation3 + $0x8] sm:$0xff] %vm488_vm2, %v1022_v46 }
 0x187   : > { %v848_v33 = vld [vmem:[#allocation3 + $0x38] sm:$0xff] }
 0x188   : > { %1131 = vst.msk [vmem:[#allocation3] sm:$0xff] %vm488_vm2, %v1123_v48  ;;  %v1003_v49 = vpop.f32.mrf.mxu2 }
 0x189   : > { %v904_v51 = vpop.f32.mrf.mxu1  ;;  %v1105_v54 = vpop.f32.mrf.mxu3 }
 0x18a   : > { %v922_v52 = vadd.f32 %v904_v51, %v844_v50  ;;  %v1217_v50 = vpop.f32.mrf.mxu0 }
 0x18b   : > { %v945_v53 = vld [vmem:[#allocation3 + $0x10] sm:$0xff] }
 0x18c   : > { %v1023_v55 = vadd.f32 %v1003_v49, %v945_v53  ;;  %930 = vst.msk [vmem:[#allocation3 + $0x18] sm:$0xff] %vm488_vm2, %v922_v52 }
 0x18d   : > { %v1046_v57 = vld [vmem:[#allocation3 + $0x8] sm:$0xff] }
 0x18e   : > { %v1124_v58 = vadd.f32 %v1102_v40, %v1046_v57  ;;  %1031 = vst.msk [vmem:[#allocation3 + $0x10] sm:$0xff] %vm488_vm2, %v1023_v55 }
 0x18f   : > { %v1148_v59 = vld [vmem:[#allocation3] sm:$0xff] }
 0x190   : > { %1132 = vst.msk [vmem:[#allocation3 + $0x8] sm:$0xff] %vm488_vm2, %v1124_v58  ;;  %v1006_v60 = vpop.f32.mrf.mxu2  ;;  %v1226_v61 = vadd.f32 %v1202_v44, %v1148_v59 }
 0x191   : > { %v907_v63 = vpop.f32.mrf.mxu1  ;;  %v1108_v4 = vpop.f32.mrf.mxu3 }
 0x192   : > { %v923_v0 = vadd.f32 %v907_v63, %v845_v62  ;;  %1234 = vst.msk [vmem:[#allocation3] sm:$0xff] %vm488_vm2, %v1226_v61  ;;  %v1220_v61 = vpop.f32.mrf.mxu0 }
 0x193   : > { %v946_v1 = vld [vmem:[#allocation3 + $0x18] sm:$0xff] }
 0x194   : > { %v1024_v2 = vadd.f32 %v1006_v60, %v946_v1  ;;  %931 = vst.msk [vmem:[#allocation3 + $0x20] sm:$0xff] %vm488_vm2, %v923_v0 }
 0x195   : > { %v1047_v3 = vld [vmem:[#allocation3 + $0x10] sm:$0xff] }
 0x196   : > { %v1125_v5 = vadd.f32 %v1105_v54, %v1047_v3  ;;  %1032 = vst.msk [vmem:[#allocation3 + $0x18] sm:$0xff] %vm488_vm2, %v1024_v2 }
 0x197   : > { %v1149_v7 = vld [vmem:[#allocation3 + $0x8] sm:$0xff] }
 0x198   : > { %1133 = vst.msk [vmem:[#allocation3 + $0x10] sm:$0xff] %vm488_vm2, %v1125_v5  ;;  %v1009_v8 = vpop.f32.mrf.mxu2  ;;  %v1227_v9 = vadd.f32 %v1205_v56, %v1149_v7  ;;  %v2488_v7 = vld [vmem:[%s2606_s5] ss:$0 sm:$0xff] }
 0x199   : > { %v910_v11 = vpop.f32.mrf.mxu1  ;;  %v1111_v17 = vpop.f32.mrf.mxu3  ;;  %v1250_v44 = vld [vmem:[#allocation3] sm:$0xff] }
 0x19a   : > { %v924_v12 = vadd.f32 %v910_v11, %v846_v10  ;;  %1235 = vst.msk [vmem:[#allocation3 + $0x8] sm:$0xff] %vm488_vm2, %v1227_v9  ;;  %v2494_v10 = vld [vmem:[%s2607_s6] ss:$0 sm:$0xff]  ;;  %v1223_v11 = vpop.f32.mrf.mxu0 }
 0x19b   : > { %v947_v13 = vld [vmem:[#allocation3 + $0x20] sm:$0xff] }
 0x19c   : > { %v1025_v14 = vadd.f32 %v1009_v8, %v947_v13  ;;  %932 = vst.msk [vmem:[#allocation3 + $0x28] sm:$0xff] %vm488_vm2, %v924_v12 }
 0x19d   : > { %v1048_v15 = vld [vmem:[#allocation3 + $0x18] sm:$0xff] }
 0x19e   : > { %v1126_v16 = vadd.f32 %v1108_v4, %v1048_v15  ;;  %1033 = vst.msk [vmem:[#allocation3 + $0x20] sm:$0xff] %vm488_vm2, %v1025_v14 }
 0x19f   : > { %v1150_v18 = vld [vmem:[#allocation3 + $0x10] sm:$0xff] }
 0x1a0   : > { %1134 = vst.msk [vmem:[#allocation3 + $0x18] sm:$0xff] %vm488_vm2, %v1126_v16  ;;  %v1012_v19 = vpop.f32.mrf.mxu2  ;;  %v1228_v20 = vadd.f32 %v1208_v6, %v1150_v18 }
 0x1a1   : > { %v913_v23 = vpop.f32.mrf.mxu1  ;;  %v1114_v32 = vpop.f32.mrf.mxu3  ;;  %v1251_v56 = vld [vmem:[#allocation3 + $0x8] sm:$0xff] }
 0x1a2   : > { %v925_v24 = vadd.f32 %v913_v23, %v847_v22  ;;  %1236 = vst.msk [vmem:[#allocation3 + $0x10] sm:$0xff] %vm488_vm2, %v1228_v20 }
 0x1a3   : > { %v948_v25 = vld [vmem:[#allocation3 + $0x28] sm:$0xff] }
 0x1a4   : > { %v1026_v26 = vadd.f32 %v1012_v19, %v948_v25  ;;  %933 = vst.msk [vmem:[#allocation3 + $0x30] sm:$0xff] %vm488_vm2, %v925_v24 }
 0x1a5   : > { %v1049_v27 = vld [vmem:[#allocation3 + $0x20] sm:$0xff] }
 0x1a6   : > { %v1127_v28 = vadd.f32 %v1111_v17, %v1049_v27  ;;  %1034 = vst.msk [vmem:[#allocation3 + $0x28] sm:$0xff] %vm488_vm2, %v1026_v26 }
 0x1a7   : > { %v1151_v29 = vld [vmem:[#allocation3 + $0x18] sm:$0xff] }
 0x1a8   : > { %1135 = vst.msk [vmem:[#allocation3 + $0x20] sm:$0xff] %vm488_vm2, %v1127_v28  ;;  %v1015_v30 = vpop.f32.mrf.mxu2  ;;  %v1229_v31 = vadd.f32 %v1211_v21, %v1151_v29 }
 0x1a9   : > { %v916_v34 = vpop.f32.mrf.mxu1  ;;  %v1117_v47 = vpop.f32.mrf.mxu3  ;;  %v1252_v4 = vld [vmem:[#allocation3 + $0x10] sm:$0xff] }
 0x1aa   : > { %v926_v35 = vadd.f32 %v916_v34, %v848_v33  ;;  %1237 = vst.msk [vmem:[#allocation3 + $0x18] sm:$0xff] %vm488_vm2, %v1229_v31 }
 0x1ab   : > { %v949_v37 = vld [vmem:[#allocation3 + $0x30] sm:$0xff] }
 0x1ac   : > { %v1027_v38 = vadd.f32 %v1015_v30, %v949_v37  ;;  %934 = vst.msk [vmem:[#allocation3 + $0x38] sm:$0xff] %vm488_vm2, %v926_v35 }
 0x1ad   : > { %v1050_v39 = vld [vmem:[#allocation3 + $0x28] sm:$0xff] }
 0x1ae   : > { %v1128_v40 = vadd.f32 %v1114_v32, %v1050_v39  ;;  %1035 = vst.msk [vmem:[#allocation3 + $0x30] sm:$0xff] %vm488_vm2, %v1027_v38 }
 0x1af   : > { %v1152_v41 = vld [vmem:[#allocation3 + $0x20] sm:$0xff] }
 0x1b0   : > { %1136 = vst.msk [vmem:[#allocation3 + $0x28] sm:$0xff] %vm488_vm2, %v1128_v40  ;;  %v1018_v42 = vpop.f32.mrf.mxu2  ;;  %v1230_v43 = vadd.f32 %v1214_v36, %v1152_v41 }
 0x1b1   : > { %v1304_v45 = vpop.f32.mrf.mxu1  ;;  %v1120_v63 = vpop.f32.mrf.mxu3  ;;  %v1253_v18 = vld [vmem:[#allocation3 + $0x18] sm:$0xff] }
 0x1b2   : > { %v1328_v46 = vadd.f32 %v1304_v45, %v1250_v44  ;;  %1238 = vst.msk [vmem:[#allocation3 + $0x20] sm:$0xff] %vm488_vm2, %v1230_v43 }
 0x1b3   : > { %v950_v48 = vld [vmem:[#allocation3 + $0x38] sm:$0xff] }
 0x1b4   : > { %v1028_v49 = vadd.f32 %v1018_v42, %v950_v48  ;;  %1336 = vst.msk [vmem:[#allocation3] sm:$0xff] %vm488_vm2, %v1328_v46 }
 0x1b5   : > { %v1051_v51 = vld [vmem:[#allocation3 + $0x30] sm:$0xff] }
 0x1b6   : > { %v1129_v52 = vadd.f32 %v1117_v47, %v1051_v51  ;;  %1036 = vst.msk [vmem:[#allocation3 + $0x38] sm:$0xff] %vm488_vm2, %v1028_v49 }
 0x1b7   : > { %v1153_v53 = vld [vmem:[#allocation3 + $0x28] sm:$0xff] }
 0x1b8   : > { %1137 = vst.msk [vmem:[#allocation3 + $0x30] sm:$0xff] %vm488_vm2, %v1129_v52  ;;  %v1406_v54 = vpop.f32.mrf.mxu2  ;;  %v1231_v55 = vadd.f32 %v1217_v50, %v1153_v53 }
 0x1b9   : > { %v1307_v57 = vpop.f32.mrf.mxu1  ;;  %v1254_v28 = vld [vmem:[#allocation3 + $0x20] sm:$0xff] }
 0x1ba   : > { %v1329_v58 = vadd.f32 %v1307_v57, %v1251_v56  ;;  %1239 = vst.msk [vmem:[#allocation3 + $0x28] sm:$0xff] %vm488_vm2, %v1231_v55 }
 0x1bb   : > { %v1352_v59 = vld [vmem:[#allocation3] sm:$0xff] }
 0x1bc   : > { %v1430_v60 = vadd.f32 %v1406_v54, %v1352_v59  ;;  %1337 = vst.msk [vmem:[#allocation3 + $0x8] sm:$0xff] %vm488_vm2, %v1329_v58 }
 0x1bd   : > { %v1052_v62 = vld [vmem:[#allocation3 + $0x38] sm:$0xff] }
 0x1be   : > { %v1130_v0 = vadd.f32 %v1120_v63, %v1052_v62  ;;  %1438 = vst.msk [vmem:[#allocation3] sm:$0xff] %vm488_vm2, %v1430_v60 }
 0x1bf   : > { %v1154_v1 = vld [vmem:[#allocation3 + $0x30] sm:$0xff] }
 0x1c0   : > { %v1232_v2 = vadd.f32 %v1220_v61, %v1154_v1  ;;  %1138 = vst.msk [vmem:[#allocation3 + $0x38] sm:$0xff] %vm488_vm2, %v1130_v0  ;;  %v1409_v3 = vpop.f32.mrf.mxu2 }
 0x1c1   : > { %v1310_v5 = vpop.f32.mrf.mxu1  ;;  %v1255_v38 = vld [vmem:[#allocation3 + $0x28] sm:$0xff] }
 0x1c2   : > { %1240 = vst.msk [vmem:[#allocation3 + $0x30] sm:$0xff] %vm488_vm2, %v1232_v2  ;;  %v1330_v6 = vadd.f32 %v1310_v5, %v1252_v4 }
 0x1c3   : > { %v1353_v8 = vld [vmem:[#allocation3 + $0x8] sm:$0xff] }
 0x1c4   : > { %v1431_v9 = vadd.f32 %v1409_v3, %v1353_v8  ;;  %1338 = vst.msk [vmem:[#allocation3 + $0x10] sm:$0xff] %vm488_vm2, %v1330_v6 }
 0x1c5   : > { %v1446_v12 = vld [vmem:[#allocation3] sm:$0xff] }
 0x1c6   : > { %1439 = vst.msk [vmem:[#allocation3 + $0x8] sm:$0xff] %vm488_vm2, %v1431_v9  ;;  %v1458_v13 = vmul.f32 %v2488_v7, %v1446_v12 }
 0x1c7   : > { %v1155_v14 = vld [vmem:[#allocation3 + $0x38] sm:$0xff] }
 0x1c8   : > { %v1233_v15 = vadd.f32 %v1223_v11, %v1155_v14  ;;  %v1412_v16 = vpop.f32.mrf.mxu2  ;;  %v1470_v17 = vadd.f32 %v2494_v10, %v1458_v13 }
 0x1c9   : > { %v1313_v19 = vpop.f32.mrf.mxu1  ;;  %v1256_v48 = vld [vmem:[#allocation3 + $0x30] sm:$0xff] }
 0x1ca   : > { %1241 = vst.msk [vmem:[#allocation3 + $0x38] sm:$0xff] %vm488_vm2, %v1233_v15  ;;  %v1331_v20 = vadd.f32 %v1313_v19, %v1253_v18  ;;  %v1478_v21 = vmax.f32 %v1470_v17, 0.0  ;;  %v1880_v17 = vld [vmem:[%s2609_s8] ss:$0 sm:$0xff] }
 0x1cb   : > { %v1354_v22 = vld [vmem:[#allocation3 + $0x10] sm:$0xff]  ;;  %v1881_v18 = vld [vmem:[%s2610_s9] ss:$0 sm:$0xff] }
 0x1cc   : > { %v1432_v23 = vadd.f32 %v1412_v16, %v1354_v22  ;;  %1339 = vst.msk [vmem:[#allocation3 + $0x18] sm:$0xff] %vm488_vm2, %v1331_v20  ;;  %1807 = vmatmul.msk.f32.vlgmr.msra.gmra.mxu3 %vm488_vm2, %v1478_v21 }
 0x1cd   : > { %v1447_v24 = vld [vmem:[#allocation3 + $0x8] sm:$0xff] }
 0x1ce   : > { %1440 = vst.msk [vmem:[#allocation3 + $0x10] sm:$0xff] %vm488_vm2, %v1432_v23  ;;  %v1459_v25 = vmul.f32 %v2488_v7, %v1447_v24  ;;  %v1882_v23 = vld [vmem:[%s2140_s28] sm:$0xff] }
 0x1d0   : > { %v1415_v26 = vpop.f32.mrf.mxu2  ;;  %v1471_v27 = vadd.f32 %v2494_v10, %v1459_v25 }
 0x1d1   : > { %v1316_v29 = vpop.f32.mrf.mxu1  ;;  %v1257_v58 = vld [vmem:[#allocation3 + $0x38] sm:$0xff] }
 0x1d2   : > { %v1332_v30 = vadd.f32 %v1316_v29, %v1254_v28  ;;  %v1479_v31 = vmax.f32 %v1471_v27, 0.0  ;;  %v1883_v28 = vld [vmem:[%s2140_s28 + $0x8] sm:$0xff] }
 0x1d3   : > { %v1355_v32 = vld [vmem:[#allocation3 + $0x18] sm:$0xff] }
 0x1d4   : > { %v1433_v33 = vadd.f32 %v1415_v26, %v1355_v32  ;;  %1340 = vst.msk [vmem:[#allocation3 + $0x20] sm:$0xff] %vm488_vm2, %v1332_v30  ;;  %1808 = vmatmul.msk.f32.gmra.mxu3 %vm488_vm2, %v1479_v31 }
 0x1d5   : > { %v1448_v34 = vld [vmem:[#allocation3 + $0x10] sm:$0xff] }
 0x1d6   : > { %1441 = vst.msk [vmem:[#allocation3 + $0x18] sm:$0xff] %vm488_vm2, %v1433_v33  ;;  %v1460_v35 = vmul.f32 %v2488_v7, %v1448_v34 }
 0x1d8   : > { %v1418_v36 = vpop.f32.mrf.mxu2  ;;  %v1472_v37 = vadd.f32 %v2494_v10, %v1460_v35  ;;  %v1884_v35 = vld [vmem:[%s2140_s28 + $0x10] sm:$0xff] }
 0x1d9   : > { %v1319_v39 = vpop.f32.mrf.mxu1 }
 0x1da   : > { %v1333_v40 = vadd.f32 %v1319_v39, %v1255_v38  ;;  %v1480_v41 = vmax.f32 %v1472_v37, 0.0 }
 0x1db   : > { %v1356_v42 = vld [vmem:[#allocation3 + $0x20] sm:$0xff] }
 0x1dc   : > { %v1434_v43 = vadd.f32 %v1418_v36, %v1356_v42  ;;  %1341 = vst.msk [vmem:[#allocation3 + $0x28] sm:$0xff] %vm488_vm2, %v1333_v40  ;;  %1809 = vmatmul.msk.f32.gmra.mxu3 %vm488_vm2, %v1480_v41  ;;  %v1885_v42 = vld [vmem:[%s2140_s28 + $0x18] sm:$0xff] }
 0x1dd   : > { %v1449_v44 = vld [vmem:[#allocation3 + $0x18] sm:$0xff] }
 0x1de   : > { %1442 = vst.msk [vmem:[#allocation3 + $0x20] sm:$0xff] %vm488_vm2, %v1434_v43  ;;  %v1461_v45 = vmul.f32 %v2488_v7, %v1449_v44 }
 0x1e0   : > { %v1421_v46 = vpop.f32.mrf.mxu2  ;;  %v1473_v47 = vadd.f32 %v2494_v10, %v1461_v45 }
 0x1e1   : > { %v1322_v49 = vpop.f32.mrf.mxu1 }
 0x1e2   : > { %v1334_v50 = vadd.f32 %v1322_v49, %v1256_v48  ;;  %v1481_v51 = vmax.f32 %v1473_v47, 0.0  ;;  %v1886_v49 = vld [vmem:[%s2140_s28 + $0x20] sm:$0xff] }
 0x1e3   : > { %v1357_v52 = vld [vmem:[#allocation3 + $0x28] sm:$0xff] }
 0x1e4   : > { %v1435_v53 = vadd.f32 %v1421_v46, %v1357_v52  ;;  %1342 = vst.msk [vmem:[#allocation3 + $0x30] sm:$0xff] %vm488_vm2, %v1334_v50  ;;  %1810 = vmatmul.msk.f32.gmra.mxu3 %vm488_vm2, %v1481_v51 }
 0x1e5   : > { %v1450_v54 = vld [vmem:[#allocation3 + $0x20] sm:$0xff] }
 0x1e6   : > { %1443 = vst.msk [vmem:[#allocation3 + $0x28] sm:$0xff] %vm488_vm2, %v1435_v53  ;;  %v1462_v55 = vmul.f32 %v2488_v7, %v1450_v54 }
 0x1e8   : > { %v1474_v56 = vadd.f32 %v2494_v10, %v1462_v55  ;;  %v1424_v57 = vpop.f32.mrf.mxu2 }
 0x1e9   : > { %v1325_v59 = vpop.f32.mrf.mxu1 }
 0x1ea   : > { %v1335_v60 = vadd.f32 %v1325_v59, %v1257_v58  ;;  %v1482_v61 = vmax.f32 %v1474_v56, 0.0  ;;  %v1887_v56 = vld [vmem:[%s2140_s28 + $0x28] sm:$0xff] }
 0x1eb   : > { %v1358_v62 = vld [vmem:[#allocation3 + $0x30] sm:$0xff] }
 0x1ec   : > { %v1436_v63 = vadd.f32 %v1424_v57, %v1358_v62  ;;  %1343 = vst.msk [vmem:[#allocation3 + $0x38] sm:$0xff] %vm488_vm2, %v1335_v60  ;;  %1811 = vmatmul.msk.f32.gmra.mxu3 %vm488_vm2, %v1482_v61 }
 0x1ed   : > { %v1451_v0 = vld [vmem:[#allocation3 + $0x28] sm:$0xff] }
 0x1ee   : > { %1444 = vst.msk [vmem:[#allocation3 + $0x30] sm:$0xff] %vm488_vm2, %v1436_v63  ;;  %v1463_v1 = vmul.f32 %v2488_v7, %v1451_v0  ;;  %v1888_v63 = vld [vmem:[%s2140_s28 + $0x30] sm:$0xff] }
 0x1f0   : > { %v1475_v2 = vadd.f32 %v2494_v10, %v1463_v1  ;;  %v1427_v3 = vpop.f32.mrf.mxu2 }
 0x1f2   : > { %v1483_v4 = vmax.f32 %v1475_v2, 0.0 }
 0x1f3   : > { %v1359_v5 = vld [vmem:[#allocation3 + $0x38] sm:$0xff] }
 0x1f4   : > { %v1437_v6 = vadd.f32 %v1427_v3, %v1359_v5  ;;  %1812 = vmatmul.msk.f32.gmra.mxu3 %vm488_vm2, %v1483_v4 }
 0x1f5   : > { %v1452_v8 = vld [vmem:[#allocation3 + $0x30] sm:$0xff] }
 0x1f6   : > { %1445 = vst.msk [vmem:[#allocation3 + $0x38] sm:$0xff] %vm488_vm2, %v1437_v6  ;;  %v1464_v9 = vmul.f32 %v2488_v7, %v1452_v8  ;;  %v1889_v6 = vld [vmem:[%s2140_s28 + $0x38] sm:$0xff] }
 0x1f8   : > { %v1476_v11 = vadd.f32 %v2494_v10, %v1464_v9 }
 0x1fa   : > { %v1484_v12 = vmax.f32 %v1476_v11, 0.0 }
 0x1fc   : > { %1813 = vmatmul.msk.f32.gmra.mxu3 %vm488_vm2, %v1484_v12 }
 0x1fd   : > { %v1453_v13 = vld [vmem:[#allocation3 + $0x38] sm:$0xff] }
 0x1fe   : > { %v1465_v14 = vmul.f32 %v2488_v7, %v1453_v13 }
 0x200   : > { %v1477_v15 = vadd.f32 %v2494_v10, %v1465_v14 }
 0x202   : > { %v1485_v16 = vmax.f32 %v1477_v15, 0.0 }
 0x204   : > { %1814 = vmatmul.msk.f32.gmra.mxu3 %vm488_vm2, %v1485_v16 }
 0x24f   : > { %v1531_v19 = vpop.f32.mrf.mxu3 }
 0x250   : > { %v1559_v20 = vmul.f32 %v1880_v17, %v1531_v19 }
 0x252   : > { %v1571_v21 = vadd.f32 %v1881_v18, %v1559_v20 }
 0x254   : > { %v1579_v22 = vmax.f32 %v1571_v21, 0.0 }
 0x256   : > { %v1587_v7 = vadd.f32 %v1882_v23, %v1579_v22 }
 0x257   : > { %v1534_v10 = vpop.f32.mrf.mxu3 }
 0x258   : > { %v1595_v24 = vmax.f32 %v1587_v7, 0.0  ;;  %v1560_v25 = vmul.f32 %v1880_v17, %v1534_v10 }
 0x25a   : > { %1603 = vst.msk [vmem:[%s2542_s15] sm:$0xff] %vm390_vm0, %v1595_v24  ;;  %v1572_v26 = vadd.f32 %v1881_v18, %v1560_v25 }
 0x25c   : > { %v1580_v27 = vmax.f32 %v1572_v26, 0.0 }
 0x25e   : > { %v1588_v29 = vadd.f32 %v1883_v28, %v1580_v27 }
 0x25f   : > { %v1537_v30 = vpop.f32.mrf.mxu3 }
 0x260   : > { %v1596_v31 = vmax.f32 %v1588_v29, 0.0  ;;  %v1561_v32 = vmul.f32 %v1880_v17, %v1537_v30 }
 0x262   : > { %1604 = vst.msk [vmem:[%s2542_s15 + $0x8] sm:$0xff] %vm390_vm0, %v1596_v31  ;;  %v1573_v33 = vadd.f32 %v1881_v18, %v1561_v32 }
 0x264   : > { %v1581_v34 = vmax.f32 %v1573_v33, 0.0 }
 0x266   : > { %v1589_v36 = vadd.f32 %v1884_v35, %v1581_v34 }
 0x267   : > { %v1540_v37 = vpop.f32.mrf.mxu3 }
 0x268   : > { %v1597_v38 = vmax.f32 %v1589_v36, 0.0  ;;  %v1562_v39 = vmul.f32 %v1880_v17, %v1540_v37 }
 0x26a   : > { %1605 = vst.msk [vmem:[%s2542_s15 + $0x10] sm:$0xff] %vm390_vm0, %v1597_v38  ;;  %v1574_v40 = vadd.f32 %v1881_v18, %v1562_v39 }
 0x26c   : > { %v1582_v41 = vmax.f32 %v1574_v40, 0.0 }
 0x26e   : > { %v1590_v43 = vadd.f32 %v1885_v42, %v1582_v41 }
 0x26f   : > { %v1543_v44 = vpop.f32.mrf.mxu3 }
 0x270   : > { %v1598_v45 = vmax.f32 %v1590_v43, 0.0  ;;  %v1563_v46 = vmul.f32 %v1880_v17, %v1543_v44 }
 0x272   : > { %1606 = vst.msk [vmem:[%s2542_s15 + $0x18] sm:$0xff] %vm390_vm0, %v1598_v45  ;;  %v1575_v47 = vadd.f32 %v1881_v18, %v1563_v46 }
 0x274   : > { %v1583_v48 = vmax.f32 %v1575_v47, 0.0 }
 0x276   : > { %v1591_v50 = vadd.f32 %v1886_v49, %v1583_v48 }
 0x277   : > { %v1546_v51 = vpop.f32.mrf.mxu3 }
 0x278   : > { %v1599_v52 = vmax.f32 %v1591_v50, 0.0  ;;  %v1564_v53 = vmul.f32 %v1880_v17, %v1546_v51 }
 0x27a   : > { %1607 = vst.msk [vmem:[%s2542_s15 + $0x20] sm:$0xff] %vm390_vm0, %v1599_v52  ;;  %v1576_v54 = vadd.f32 %v1881_v18, %v1564_v53 }
 0x27c   : > { %v1584_v55 = vmax.f32 %v1576_v54, 0.0 }
 0x27e   : > { %v1592_v57 = vadd.f32 %v1887_v56, %v1584_v55 }
 0x27f   : > { %v1549_v58 = vpop.f32.mrf.mxu3 }
 0x280   : > { %v1600_v59 = vmax.f32 %v1592_v57, 0.0  ;;  %v1565_v60 = vmul.f32 %v1880_v17, %v1549_v58 }
 0x282   : > { %1608 = vst.msk [vmem:[%s2542_s15 + $0x28] sm:$0xff] %vm390_vm0, %v1600_v59  ;;  %v1577_v61 = vadd.f32 %v1881_v18, %v1565_v60 }
 0x284   : > { %v1585_v62 = vmax.f32 %v1577_v61, 0.0 }
 0x286   : > { %v1593_v0 = vadd.f32 %v1888_v63, %v1585_v62 }
 0x287   : > { %v1552_v1 = vpop.f32.mrf.mxu3 }
 0x288   : > { %v1601_v2 = vmax.f32 %v1593_v0, 0.0  ;;  %v1566_v3 = vmul.f32 %v1880_v17, %v1552_v1 }
 0x28a   : > { %1609 = vst.msk [vmem:[%s2542_s15 + $0x30] sm:$0xff] %vm390_vm0, %v1601_v2  ;;  %v1578_v4 = vadd.f32 %v1881_v18, %v1566_v3 }
 0x28c   : > { %v1586_v5 = vmax.f32 %v1578_v4, 0.0 }
 0x28e   : > { %v1594_v8 = vadd.f32 %v1889_v6, %v1586_v5 }
 0x290   : > { %v1602_v9 = vmax.f32 %v1594_v8, 0.0 }
 0x292   : > { %1610 = vst.msk [vmem:[%s2542_s15 + $0x38] sm:$0xff] %vm390_vm0, %v1602_v9 }
 0x293   : > { %1947 = shalt.err (!%p1944_p4)
}
 0x294   : > { %s1991_s18 = smov 128   ;;  %s1992_s15 = smov 8  }
 0x295   : > { %1827 = dma.vmem_to_hbm [thread:$0]  (%p2098_p11), %s1625_s24, 1024, %s1627_s29, %s1612_s17, %s1991_s18, %s1991_s18, %s1992_s15  }
 0x296 PF: > { %s1641_s22 = sand.u32 1, %s1974_s13   ;;  %p2626_p7 = scmp.ge.s32.totalorder %s1986_s16, 2 }
 0x297   : > { %s1642_s20 = scalar_lea.sflag [#allocation6], %s1641_s22 }
 0x298   : > { %p1834_p5 = pnand %p2626_p7, %p2102_p12 }
 0x29a   : > { %p1835_p8 = pneg %p1834_p5 }
 0x29c   : > { %1969 = dma.done.wait (%p1835_p8), %s1642_s20, 1024  }
 0x29d   : > { %1971 = vsyncadd (%p1835_p8), %s1642_s20, 4294966272  ;;  %s2627_s16 = sld [smem:[#allocation11_spill]]  ;;  %s2630_s13 = smov %s1978_s14 }
 0x29e   : > { %s2628_s21 = sld [smem:[#allocation10_spill]] }
 0x29f   : > { %s2629_s15 = sld [smem:[#allocation12_spill]] }
 0x2a3   : > { %p23_p10 = scmp.ge.s32.totalorder %s2627_s16, 4  }
 0x2a4   : > { %s2631_s14 = smov %s2628_s21 }
 0x2a5   :  { %25 = sbr.rel (!%p23_p10) target bundleno = 5 (0x5), region = 115 }
 0x2aa   :  { %1648 = vsyncpa [#allocation5], 1 }
 0x2ab   :  { %1650 = vsyncpa [#allocation5 + $0x1], 1 }
 0x2ac   :  { %1651 = vsyncpa [#allocation6], 1 }
 0x2ad   :  { %1653 = vsyncpa [#allocation6 + $0x1], 1 }

</bundles_post_ra>
